<compile_context>
chip_gen: v6e
topology: v6e:2x2x1
jax: 0.10.0
libtpu: 0.0.40
codegen_flags: <defaults>
</compile_context>

<pallas_src>
import jax
import jax.numpy as jnp
from jax.experimental import pallas as pl
from jax.experimental.pallas import tpu as pltpu

NUM_ORGANS = 2    # liver, lung
SEQ_LEN = 2       # [x, x_1] time steps
HID = 32          # LSTM hidden / feature width (num_classes=32)
STEM_C = 32       # stem conv output channels
KH = KW = 3       # stem conv kernel
STRIDE = 2


# --------------------------------------------------------------------------
# Fused extractor: stem matmul + (folded) BN + swish + GAP + fc, one call
# --------------------------------------------------------------------------
def _pick_tile(n_pix):
    """Pixel-tile size: multiple of 8 dividing n_pix, capped at 512."""
    if n_pix <= 512:
        return n_pix
    for t in (512, 256, 128, 64, 32, 16, 8):
        if n_pix % t == 0:
            return t
    return n_pix


def _fused_extractor(patches, params):
    """patches: (organs, images, n_pix, 9) -> features (organs, images, 32)."""
    n_org, n_img, n_pix, kk = patches.shape
    tile_p = _pick_tile(n_pix)
    n_t = n_pix // tile_p
    inv_npix = 1.0 / float(n_pix)

    def kernel(p_ref, w_ref, b_ref, fcw_ref, fcb_ref, o_ref, acc_ref):
        t = pl.program_id(2)

        @pl.when(t == 0)
        def _():
            acc_ref[...] = jnp.zeros_like(acc_ref)

        # stem conv as im2col matmul; BN (eval) already folded into w/b.
        y = jnp.dot(p_ref[0, 0], w_ref[0],
                    preferred_element_type=jnp.float32)     # (tile_p, 32)
        y = y + b_ref[0]
        y = y * jax.nn.sigmoid(y)                            # swish / SiLU
        acc_ref[...] += jnp.sum(y, axis=0, keepdims=True)    # GAP accumulation

        @pl.when(t == n_t - 1)
        def _():
            g = acc_ref[...] * inv_npix                      # global avg pool
            o_ref[0, 0] = (jnp.dot(g, fcw_ref[0],
                                   preferred_element_type=jnp.float32)
                           + fcb_ref[0])                     # fc 32 -> 32

    out = pl.pallas_call(
        kernel,
        out_shape=jax.ShapeDtypeStruct((n_org, n_img, 1, HID), jnp.float32),
        grid_spec=pltpu.PrefetchScalarGridSpec(
            num_scalar_prefetch=0,
            grid=(n_org, n_img, n_t),
            in_specs=[
                pl.BlockSpec((1, 1, tile_p, kk), lambda o, n, t: (o, n, t, 0)),
                pl.BlockSpec((1, KH * KW, STEM_C), lambda o, n, t: (o, 0, 0)),
                pl.BlockSpec((1, 1, STEM_C), lambda o, n, t: (o, 0, 0)),
                pl.BlockSpec((1, STEM_C, HID), lambda o, n, t: (o, 0, 0)),
                pl.BlockSpec((1, 1, HID), lambda o, n, t: (o, 0, 0)),
            ],
            out_specs=pl.BlockSpec((1, 1, 1, HID), lambda o, n, t: (o, n, 0, 0)),
            scratch_shapes=[pltpu.VMEM((1, HID), jnp.float32)],
        ),
        compiler_params=pltpu.CompilerParams(
            dimension_semantics=("parallel", "parallel", "arbitrary")),
    )(patches, params["ext_stem_wT"], params["ext_stem_b"],
      params["ext_fc_wT"], params["ext_fc_b"])
    return out.reshape(n_org, n_img, HID)


# --------------------------------------------------------------------------
# LSTM (2 layers, seq_len 2, per organ) + classifier head, one call
# --------------------------------------------------------------------------
def _head_kernel(f_ref, w_ref, b_ref, w1_ref, b1_ref, w2_ref, b2_ref, o_ref):
    # f_ref: (organ, time, Bp, 32); w_ref: (organ, layer, 64, 128) stacked
    # [W_ih^T ; W_hh^T]; b_ref: (organ, layer, 1, 128) = b_ih + b_hh.
    bp = f_ref.shape[2]

    def cell(x, h, c, w, b):
        # single merged gate matmul: [x, h] @ [W_ih^T ; W_hh^T]
        gates = jnp.dot(jnp.concatenate([x, h], axis=1), w,
                        preferred_element_type=jnp.float32) + b
        i = jax.nn.sigmoid(gates[:, 0 * HID:1 * HID])        # PyTorch order
        f = jax.nn.sigmoid(gates[:, 1 * HID:2 * HID])        # i, f, g, o
        g = jnp.tanh(gates[:, 2 * HID:3 * HID])
        o = jax.nn.sigmoid(gates[:, 3 * HID:4 * HID])
        c_new = f * c + i * g
        return o * jnp.tanh(c_new), c_new

    def run_lstm(organ):
        w0, b0 = w_ref[organ, 0], b_ref[organ, 0]
        w1, b1 = w_ref[organ, 1], b_ref[organ, 1]
        z = jnp.zeros((bp, HID), jnp.float32)
        h0, c0, h1, c1 = z, z, z, z
        for t in range(SEQ_LEN):                             # seq len is 2
            x_t = f_ref[organ, t]
            h0, c0 = cell(x_t, h0, c0, w0, b0)               # layer 0
            h1, c1 = cell(h0, h1, c1, w1, b1)                # layer 1
        return h1                                            # last hidden

    feat = jnp.concatenate([run_lstm(0), run_lstm(1)], axis=1)   # (Bp, 64)
    z = (jnp.dot(feat, w1_ref[...], preferred_element_type=jnp.float32)
         + b1_ref[...])                                      # cls_1
    # nn.Dropout(p=0.1) is the identity in eval mode.
    z = jnp.maximum(z, 0.0)                                  # ReLU
    o_ref[...] = (jnp.dot(z, w2_ref[...], preferred_element_type=jnp.float32)
                  + b2_ref[...])                             # cls_2 -> (Bp, 1)


def _lstm_head(feats, params):
    bp = feats.shape[2]
    vmem = lambda: pl.BlockSpec(memory_space=pltpu.MemorySpace.VMEM)
    args = (feats, params["lstm_w"], params["lstm_b"],
            params["cls1_wT"], params["cls1_b"],
            params["cls2_wT"], params["cls2_b"])
    return pl.pallas_call(
        _head_kernel,
        out_shape=jax.ShapeDtypeStruct((bp, 1), jnp.float32),
        in_specs=[vmem() for _ in range(len(args))],
        out_specs=vmem(),
    )(*args)


# --------------------------------------------------------------------------
# Glue (plain JAX): im2col, full forward
# --------------------------------------------------------------------------
def _im2col(x_imgs):
    """(N, H, W) -> (N, OH*OW, 9) patches, TF-'same' pad for k=3, s=2."""
    n, h, w = x_imgs.shape
    oh, ow = h // STRIDE, w // STRIDE
    xp = jnp.pad(x_imgs, ((0, 0), (0, 1), (0, 1)))
    taps = [xp[:, kh::STRIDE, kw::STRIDE][:, :oh, :ow]
            for kh in range(KH) for kw in range(KW)]
    p = jnp.stack(taps, axis=-1)                 # (N, OH, OW, 9)
    return p.reshape(n, oh * ow, KH * KW), oh * ow


def prognosis_model_d_forward(x_liver, x_lung, x_liver_1, x_lung_1, params):
    b = x_liver.shape[0]
    # for idx in range(1): only channel 0 is used; mean over a 1-element stack
    # is the identity.  Batch the two time steps along the row axis and the
    # two organs along a leading axis so ONE extractor call covers everything.
    liver_imgs = jnp.concatenate([x_liver[:, 0], x_liver_1[:, 0]], axis=0)
    lung_imgs = jnp.concatenate([x_lung[:, 0], x_lung_1[:, 0]], axis=0)
    imgs = jnp.stack([liver_imgs, lung_imgs], axis=0)        # (2, 2B, H, W)
    n_org, n_img, h, w = imgs.shape

    patches, n_pix = _im2col(imgs.reshape(n_org * n_img, h, w))
    patches = patches.reshape(n_org, n_img, n_pix, KH * KW)

    feats = _fused_extractor(patches, params)                # (2, 2B, 32)

    # -> (organ, time, batch, feat); pad batch rows to a sublane multiple.
    feats = feats.reshape(NUM_ORGANS, SEQ_LEN, b, HID)
    bp = ((b + 7) // 8) * 8
    feats = jnp.pad(feats, ((0, 0), (0, 0), (0, bp - b), (0, 0)))

    out = _lstm_head(feats, params)                          # (Bp, 1)
    return out[:b]                                           # (B, 1)


# --------------------------------------------------------------------------
# Deterministic parameter init (synthetic; no checkpoint load)
# --------------------------------------------------------------------------
def init_params(key):
    keys = iter(jax.random.split(key, 16))

    def nrm(shape, scale=0.1):
        return (scale * jax.random.normal(next(keys), shape)).astype(jnp.float32)

    # BatchNorm (eval mode) folded into the stem conv:
    #   w <- w * gamma / sqrt(var + eps),  b <- beta - mean * gamma / sqrt(var + eps)
    bn_scale = 1.0 / jnp.sqrt(jnp.float32(1.0 + 1e-3))
    return dict(
        ext_stem_wT=nrm((NUM_ORGANS, KH * KW, STEM_C)) * bn_scale,   # (2, 9, 32)
        ext_stem_b=jnp.zeros((NUM_ORGANS, 1, STEM_C), jnp.float32),
        ext_fc_wT=nrm((NUM_ORGANS, STEM_C, HID)),                    # (2, 32, 32)
        ext_fc_b=nrm((NUM_ORGANS, 1, HID)),
        # LSTM slabs: w = [W_ih^T ; W_hh^T] -> (organ, layer, 64, 128),
        #             b = b_ih + b_hh      -> (organ, layer, 1, 128)
        lstm_w=nrm((NUM_ORGANS, 2, 2 * HID, 4 * HID)),
        lstm_b=nrm((NUM_ORGANS, 2, 1, 4 * HID)),
        cls1_wT=nrm((2 * HID, 8)), cls1_b=nrm((1, 8)),
        cls2_wT=nrm((8, 1)), cls2_b=nrm((1, 1)),
    )


if __name__ == "__main__":
    key = jax.random.PRNGKey(0)
    k1, k2, k3, k4, kp = jax.random.split(key, 5)
    B, C, H, W = 2, 4, 16, 16
    x_liver = jax.random.normal(k1, (B, C, H, W), jnp.float32)
    x_lung = jax.random.normal(k2, (B, C, H, W), jnp.float32)
    x_liver_1 = jax.random.normal(k3, (B, C, H, W), jnp.float32)
    x_lung_1 = jax.random.normal(k4, (B, C, H, W), jnp.float32)

    params = init_params(kp)
    fwd = jax.jit(prognosis_model_d_forward)
    out = fwd(x_liver, x_lung, x_liver_1, x_lung_1, params)
    out = jax.block_until_ready(out)
    assert out.shape == (B, 1) and out.dtype == jnp.float32
    assert bool(jnp.all(jnp.isfinite(out)))
    print("KERNEL_OK")
</pallas_src>

<mosaic_0001>
module attributes {stable_mosaic.version = 11 : i64} {
  func.func @kernel(%arg0: i32, %arg1: i32, %arg2: i32, %arg3: memref<1x1x64x9xf32, #tpu.memory_space<vmem>>, %arg4: memref<1x9x32xf32, #tpu.memory_space<vmem>>, %arg5: memref<1x1x32xf32, #tpu.memory_space<vmem>>, %arg6: memref<1x32x32xf32, #tpu.memory_space<vmem>>, %arg7: memref<1x1x32xf32, #tpu.memory_space<vmem>>, %arg8: memref<1x1x1x32xf32, #tpu.memory_space<vmem>>, %arg9: memref<1x32xf32, #tpu.memory_space<vmem>>) attributes {dimension_semantics = [#tpu.dimension_semantics<parallel>, #tpu.dimension_semantics<parallel>, #tpu.dimension_semantics<arbitrary>], iteration_bounds = array<i64: 2, 4, 1>, scalar_prefetch = 0 : i64, scratch_operands = 1 : i64, tpu.core_type = #tpu.core_type<tc>, window_params = [{transform_indices = @transform_0, window_bounds = array<i64: 1, 1, 64, 9>}, {transform_indices = @transform_1, window_bounds = array<i64: 1, 9, 32>}, {transform_indices = @transform_2, window_bounds = array<i64: 1, 1, 32>}, {transform_indices = @transform_3, window_bounds = array<i64: 1, 32, 32>}, {transform_indices = @transform_4, window_bounds = array<i64: 1, 1, 32>}, {transform_indices = @transform_5, window_bounds = array<i64: 1, 1, 1, 32>}]} {
    %c0_i32 = arith.constant 0 : i32
    %0 = arith.cmpi eq, %arg2, %c0_i32 : i32
    %1 = arith.extui %0 : i1 to i32
    %c0_i32_0 = arith.constant 0 : i32
    %2 = arith.cmpi ne, %1, %c0_i32_0 : i32
    scf.if %2 {
      %cst_18 = arith.constant 0.000000e+00 : f32
      %26 = vector.broadcast %cst_18 : f32 to vector<1x32xf32>
      %c0_19 = arith.constant 0 : index
      %c0_20 = arith.constant 0 : index
      %27 = vector.load %arg9[%c0_19, %c0_20] : memref<1x32xf32, #tpu.memory_space<vmem>>, vector<1x32xf32>
      tpu.vector_store %arg9[%c0_19, %c0_20], %26 {strides = array<i32>} : memref<1x32xf32, #tpu.memory_space<vmem>>, vector<1x32xf32>,
    } else {
    }
    %c0 = arith.constant 0 : index
    %c0_1 = arith.constant 0 : index
    %c0_2 = arith.constant 0 : index
    %c0_3 = arith.constant 0 : index
    %3 = vector.load %arg3[%c0, %c0_1, %c0_2, %c0_3] : memref<1x1x64x9xf32, #tpu.memory_space<vmem>>, vector<1x1x64x9xf32>
    %4 = vector.shape_cast %3 : vector<1x1x64x9xf32> to vector<64x9xf32>
    %c0_4 = arith.constant 0 : index
    %c0_5 = arith.constant 0 : index
    %c0_6 = arith.constant 0 : index
    %5 = vector.load %arg4[%c0_4, %c0_5, %c0_6] : memref<1x9x32xf32, #tpu.memory_space<vmem>>, vector<1x9x32xf32>
    %6 = vector.shape_cast %5 : vector<1x9x32xf32> to vector<9x32xf32>
    %cst = arith.constant dense<0.000000e+00> : vector<64x32xf32>
    %7 = tpu.matmul %4, %6, %cst {dimension_numbers = #tpu.dot_dimension_numbers<[1], [0], [0], [1], [0, 0, 1, 1], [], []>} : vector<64x9xf32>, vector<9x32xf32>, vector<64x32xf32> -> vector<64x32xf32>
    %c0_7 = arith.constant 0 : index
    %c0_8 = arith.constant 0 : index
    %c0_9 = arith.constant 0 : index
    %8 = vector.load %arg5[%c0_7, %c0_8, %c0_9] : memref<1x1x32xf32, #tpu.memory_space<vmem>>, vector<1x1x32xf32>
    %9 = vector.shape_cast %8 : vector<1x1x32xf32> to vector<1x32xf32>
    %10 = vector.broadcast %9 : vector<1x32xf32> to vector<64x32xf32>
    %11 = arith.addf %7, %10 : vector<64x32xf32>
    %12 = arith.negf %11 : vector<64x32xf32>
    %13 = math.exp %12 : vector<64x32xf32>
    %cst_10 = arith.constant 1.000000e+00 : f32
    %14 = vector.broadcast %cst_10 : f32 to vector<64x32xf32>
    %15 = arith.addf %14, %13 : vector<64x32xf32>
    %16 = arith.divf %14, %15 : vector<64x32xf32>
    %17 = arith.mulf %11, %16 : vector<64x32xf32>
    %c0_11 = arith.constant 0 : index
    %c0_12 = arith.constant 0 : index
    %18 = vector.load %arg9[%c0_11, %c0_12] : memref<1x32xf32, #tpu.memory_space<vmem>>, vector<1x32xf32>
    %cst_13 = arith.constant dense<0.000000e+00> : vector<32xf32>
    %19 = vector.multi_reduction <add>, %17, %cst_13 [0] : vector<64x32xf32> to vector<32xf32>
    %20 = vector.shape_cast %19 : vector<32xf32> to vector<1x32xf32>
    %21 = arith.addf %18, %20 : vector<1x32xf32>
    %c0_14 = arith.constant 0 : index
    %c0_15 = arith.constant 0 : index
    %22 = vector.load %arg9[%c0_14, %c0_15] : memref<1x32xf32, #tpu.memory_space<vmem>>, vector<1x32xf32>
    tpu.vector_store %arg9[%c0_14, %c0_15], %21 {strides = array<i32>} : memref<1x32xf32, #tpu.memory_space<vmem>>, vector<1x32xf32>,
    %c0_i32_16 = arith.constant 0 : i32
    %23 = arith.cmpi eq, %arg2, %c0_i32_16 : i32
    %24 = arith.extui %23 : i1 to i32
    %c0_i32_17 = arith.constant 0 : i32
    %25 = arith.cmpi ne, %24, %c0_i32_17 : i32
    scf.if %25 {
      %c0_18 = arith.constant 0 : index
      %c0_19 = arith.constant 0 : index
      %26 = vector.load %arg9[%c0_18, %c0_19] : memref<1x32xf32, #tpu.memory_space<vmem>>, vector<1x32xf32>
      %cst_20 = arith.constant 1.562500e-02 : f32
      %27 = vector.broadcast %cst_20 : f32 to vector<1x32xf32>
      %28 = arith.mulf %26, %27 : vector<1x32xf32>
      %c0_21 = arith.constant 0 : index
      %c0_22 = arith.constant 0 : index
      %c0_23 = arith.constant 0 : index
      %29 = vector.load %arg6[%c0_21, %c0_22, %c0_23] : memref<1x32x32xf32, #tpu.memory_space<vmem>>, vector<1x32x32xf32>
      %30 = vector.shape_cast %29 : vector<1x32x32xf32> to vector<32x32xf32>
      %cst_24 = arith.constant dense<0.000000e+00> : vector<1x32xf32>
      %31 = tpu.matmul %28, %30, %cst_24 {dimension_numbers = #tpu.dot_dimension_numbers<[1], [0], [0], [1], [0, 0, 1, 1], [], []>} : vector<1x32xf32>, vector<32x32xf32>, vector<1x32xf32> -> vector<1x32xf32>
      %c0_25 = arith.constant 0 : index
      %c0_26 = arith.constant 0 : index
      %c0_27 = arith.constant 0 : index
      %32 = vector.load %arg7[%c0_25, %c0_26, %c0_27] : memref<1x1x32xf32, #tpu.memory_space<vmem>>, vector<1x1x32xf32>
      %33 = vector.shape_cast %32 : vector<1x1x32xf32> to vector<1x32xf32>
      %34 = arith.addf %31, %33 : vector<1x32xf32>
      %c0_28 = arith.constant 0 : index
      %c0_29 = arith.constant 0 : index
      %c0_30 = arith.constant 0 : index
      %c0_31 = arith.constant 0 : index
      %35 = vector.load %arg8[%c0_28, %c0_29, %c0_30, %c0_31] : memref<1x1x1x32xf32, #tpu.memory_space<vmem>>, vector<1x1x1x32xf32>
      %36 = vector.shape_cast %35 : vector<1x1x1x32xf32> to vector<1x32xf32>
      %37 = vector.shape_cast %34 : vector<1x32xf32> to vector<1x1x1x32xf32>
      tpu.vector_store %arg8[%c0_28, %c0_29, %c0_30, %c0_31], %37 {strides = array<i32>} : memref<1x1x1x32xf32, #tpu.memory_space<vmem>>, vector<1x1x1x32xf32>,
    } else {
    }
    return
  }
  func.func @transform_0(%arg0: i32, %arg1: i32, %arg2: i32) -> (i32, i32, i32, i32) {
    %c0_i32 = arith.constant 0 : i32
    %c0_i32_0 = arith.constant 0 : i32
    return %arg0, %arg1, %arg2, %c0_i32 : i32, i32, i32, i32
  }
  func.func @transform_1(%arg0: i32, %arg1: i32, %arg2: i32) -> (i32, i32, i32) {
    %c0_i32 = arith.constant 0 : i32
    %c0_i32_0 = arith.constant 0 : i32
    %c0_i32_1 = arith.constant 0 : i32
    return %arg0, %c0_i32, %c0_i32_0 : i32, i32, i32
  }
  func.func @transform_2(%arg0: i32, %arg1: i32, %arg2: i32) -> (i32, i32, i32) {
    %c0_i32 = arith.constant 0 : i32
    %c0_i32_0 = arith.constant 0 : i32
    %c0_i32_1 = arith.constant 0 : i32
    return %arg0, %c0_i32, %c0_i32_0 : i32, i32, i32
  }
  func.func @transform_3(%arg0: i32, %arg1: i32, %arg2: i32) -> (i32, i32, i32) {
    %c0_i32 = arith.constant 0 : i32
    %c0_i32_0 = arith.constant 0 : i32
    %c0_i32_1 = arith.constant 0 : i32
    return %arg0, %c0_i32, %c0_i32_0 : i32, i32, i32
  }
  func.func @transform_4(%arg0: i32, %arg1: i32, %arg2: i32) -> (i32, i32, i32) {
    %c0_i32 = arith.constant 0 : i32
    %c0_i32_0 = arith.constant 0 : i32
    %c0_i32_1 = arith.constant 0 : i32
    return %arg0, %c0_i32, %c0_i32_0 : i32, i32, i32
  }
  func.func @transform_5(%arg0: i32, %arg1: i32, %arg2: i32) -> (i32, i32, i32, i32) {
    %c0_i32 = arith.constant 0 : i32
    %c0_i32_0 = arith.constant 0 : i32
    %c0_i32_1 = arith.constant 0 : i32
    return %arg0, %arg1, %c0_i32, %c0_i32_0 : i32, i32, i32, i32
  }
}

module attributes {stable_mosaic.version = 11 : i64} {
  func.func @_head_kernel(%arg0: memref<2x2x8x32xf32, #tpu.memory_space<vmem>>, %arg1: memref<2x2x64x128xf32, #tpu.memory_space<vmem>>, %arg2: memref<2x2x1x128xf32, #tpu.memory_space<vmem>>, %arg3: memref<64x8xf32, #tpu.memory_space<vmem>>, %arg4: memref<1x8xf32, #tpu.memory_space<vmem>>, %arg5: memref<8x1xf32, #tpu.memory_space<vmem>>, %arg6: memref<1x1xf32, #tpu.memory_space<vmem>>, %arg7: memref<8x1xf32, #tpu.memory_space<vmem>>) attributes {dimension_semantics = [], scalar_prefetch = 0 : i64, scratch_operands = 0 : i64, tpu.core_type = #tpu.core_type<tc>} {
    %c0 = arith.constant 0 : index
    %c0_0 = arith.constant 0 : index
    %c0_1 = arith.constant 0 : index
    %c0_2 = arith.constant 0 : index
    %0 = vector.load %arg1[%c0, %c0_0, %c0_1, %c0_2] : memref<2x2x64x128xf32, #tpu.memory_space<vmem>>, vector<1x1x64x128xf32>
    %1 = vector.shape_cast %0 : vector<1x1x64x128xf32> to vector<64x128xf32>
    %c0_3 = arith.constant 0 : index
    %c0_4 = arith.constant 0 : index
    %c0_5 = arith.constant 0 : index
    %c0_6 = arith.constant 0 : index
    %2 = vector.load %arg2[%c0_3, %c0_4, %c0_5, %c0_6] : memref<2x2x1x128xf32, #tpu.memory_space<vmem>>, vector<1x1x1x128xf32>
    %3 = vector.shape_cast %2 : vector<1x1x1x128xf32> to vector<1x128xf32>
    %c0_7 = arith.constant 0 : index
    %c1 = arith.constant 1 : index
    %c0_8 = arith.constant 0 : index
    %c0_9 = arith.constant 0 : index
    %4 = vector.load %arg1[%c0_7, %c1, %c0_8, %c0_9] : memref<2x2x64x128xf32, #tpu.memory_space<vmem>>, vector<1x1x64x128xf32>
    %5 = vector.shape_cast %4 : vector<1x1x64x128xf32> to vector<64x128xf32>
    %c0_10 = arith.constant 0 : index
    %c1_11 = arith.constant 1 : index
    %c0_12 = arith.constant 0 : index
    %c0_13 = arith.constant 0 : index
    %6 = vector.load %arg2[%c0_10, %c1_11, %c0_12, %c0_13] : memref<2x2x1x128xf32, #tpu.memory_space<vmem>>, vector<1x1x1x128xf32>
    %7 = vector.shape_cast %6 : vector<1x1x1x128xf32> to vector<1x128xf32>
    %cst = arith.constant 0.000000e+00 : f32
    %8 = vector.broadcast %cst : f32 to vector<8x32xf32>
    %c0_14 = arith.constant 0 : index
    %c0_15 = arith.constant 0 : index
    %c0_16 = arith.constant 0 : index
    %c0_17 = arith.constant 0 : index
    %9 = vector.load %arg0[%c0_14, %c0_15, %c0_16, %c0_17] : memref<2x2x8x32xf32, #tpu.memory_space<vmem>>, vector<1x1x8x32xf32>
    %10 = vector.shape_cast %9 : vector<1x1x8x32xf32> to vector<8x32xf32>
    %11 = tpu.concatenate %10, %8 in 1 : vector<8x32xf32>, vector<8x32xf32> -> vector<8x64xf32>
    %cst_18 = arith.constant dense<0.000000e+00> : vector<8x128xf32>
    %12 = tpu.matmul %11, %1, %cst_18 {dimension_numbers = #tpu.dot_dimension_numbers<[1], [0], [0], [1], [0, 0, 1, 1], [], []>} : vector<8x64xf32>, vector<64x128xf32>, vector<8x128xf32> -> vector<8x128xf32>
    %13 = vector.broadcast %3 : vector<1x128xf32> to vector<8x128xf32>
    %14 = arith.addf %12, %13 : vector<8x128xf32>
    %15 = vector.extract_strided_slice %14 {offsets = [0, 0], sizes = [8, 32], strides = [1, 1]} : vector<8x128xf32> to vector<8x32xf32>
    %16 = arith.negf %15 : vector<8x32xf32>
    %17 = math.exp %16 : vector<8x32xf32>
    %cst_19 = arith.constant 1.000000e+00 : f32
    %18 = vector.broadcast %cst_19 : f32 to vector<8x32xf32>
    %19 = arith.addf %18, %17 : vector<8x32xf32>
    %20 = arith.divf %18, %19 : vector<8x32xf32>
    %21 = vector.extract_strided_slice %14 {offsets = [0, 32], sizes = [8, 32], strides = [1, 1]} : vector<8x128xf32> to vector<8x32xf32>
    %22 = arith.negf %21 : vector<8x32xf32>
    %23 = math.exp %22 : vector<8x32xf32>
    %cst_20 = arith.constant 1.000000e+00 : f32
    %24 = vector.broadcast %cst_20 : f32 to vector<8x32xf32>
    %25 = arith.addf %24, %23 : vector<8x32xf32>
    %26 = arith.divf %24, %25 : vector<8x32xf32>
    %27 = vector.extract_strided_slice %14 {offsets = [0, 64], sizes = [8, 32], strides = [1, 1]} : vector<8x128xf32> to vector<8x32xf32>
    %28 = math.tanh %27 : vector<8x32xf32>
    %29 = vector.extract_strided_slice %14 {offsets = [0, 96], sizes = [8, 32], strides = [1, 1]} : vector<8x128xf32> to vector<8x32xf32>
    %30 = arith.negf %29 : vector<8x32xf32>
    %31 = math.exp %30 : vector<8x32xf32>
    %cst_21 = arith.constant 1.000000e+00 : f32
    %32 = vector.broadcast %cst_21 : f32 to vector<8x32xf32>
    %33 = arith.addf %32, %31 : vector<8x32xf32>
    %34 = arith.divf %32, %33 : vector<8x32xf32>
    %35 = arith.mulf %26, %8 : vector<8x32xf32>
    %36 = arith.mulf %20, %28 : vector<8x32xf32>
    %37 = arith.addf %35, %36 : vector<8x32xf32>
    %38 = math.tanh %37 : vector<8x32xf32>
    %39 = arith.mulf %34, %38 : vector<8x32xf32>
    %40 = tpu.concatenate %39, %8 in 1 : vector<8x32xf32>, vector<8x32xf32> -> vector<8x64xf32>
    %cst_22 = arith.constant dense<0.000000e+00> : vector<8x128xf32>
    %41 = tpu.matmul %40, %5, %cst_22 {dimension_numbers = #tpu.dot_dimension_numbers<[1], [0], [0], [1], [0, 0, 1, 1], [], []>} : vector<8x64xf32>, vector<64x128xf32>, vector<8x128xf32> -> vector<8x128xf32>
    %42 = vector.broadcast %7 : vector<1x128xf32> to vector<8x128xf32>
    %43 = arith.addf %41, %42 : vector<8x128xf32>
    %44 = vector.extract_strided_slice %43 {offsets = [0, 0], sizes = [8, 32], strides = [1, 1]} : vector<8x128xf32> to vector<8x32xf32>
    %45 = arith.negf %44 : vector<8x32xf32>
    %46 = math.exp %45 : vector<8x32xf32>
    %cst_23 = arith.constant 1.000000e+00 : f32
    %47 = vector.broadcast %cst_23 : f32 to vector<8x32xf32>
    %48 = arith.addf %47, %46 : vector<8x32xf32>
    %49 = arith.divf %47, %48 : vector<8x32xf32>
    %50 = vector.extract_strided_slice %43 {offsets = [0, 32], sizes = [8, 32], strides = [1, 1]} : vector<8x128xf32> to vector<8x32xf32>
    %51 = arith.negf %50 : vector<8x32xf32>
    %52 = math.exp %51 : vector<8x32xf32>
    %cst_24 = arith.constant 1.000000e+00 : f32
    %53 = vector.broadcast %cst_24 : f32 to vector<8x32xf32>
    %54 = arith.addf %53, %52 : vector<8x32xf32>
    %55 = arith.divf %53, %54 : vector<8x32xf32>
    %56 = vector.extract_strided_slice %43 {offsets = [0, 64], sizes = [8, 32], strides = [1, 1]} : vector<8x128xf32> to vector<8x32xf32>
    %57 = math.tanh %56 : vector<8x32xf32>
    %58 = vector.extract_strided_slice %43 {offsets = [0, 96], sizes = [8, 32], strides = [1, 1]} : vector<8x128xf32> to vector<8x32xf32>
    %59 = arith.negf %58 : vector<8x32xf32>
    %60 = math.exp %59 : vector<8x32xf32>
    %cst_25 = arith.constant 1.000000e+00 : f32
    %61 = vector.broadcast %cst_25 : f32 to vector<8x32xf32>
    %62 = arith.addf %61, %60 : vector<8x32xf32>
    %63 = arith.divf %61, %62 : vector<8x32xf32>
    %64 = arith.mulf %55, %8 : vector<8x32xf32>
    %65 = arith.mulf %49, %57 : vector<8x32xf32>
    %66 = arith.addf %64, %65 : vector<8x32xf32>
    %67 = math.tanh %66 : vector<8x32xf32>
    %68 = arith.mulf %63, %67 : vector<8x32xf32>
    %c0_26 = arith.constant 0 : index
    %c1_27 = arith.constant 1 : index
    %c0_28 = arith.constant 0 : index
    %c0_29 = arith.constant 0 : index
    %69 = vector.load %arg0[%c0_26, %c1_27, %c0_28, %c0_29] : memref<2x2x8x32xf32, #tpu.memory_space<vmem>>, vector<1x1x8x32xf32>
    %70 = vector.shape_cast %69 : vector<1x1x8x32xf32> to vector<8x32xf32>
    %71 = tpu.concatenate %70, %39 in 1 : vector<8x32xf32>, vector<8x32xf32> -> vector<8x64xf32>
    %cst_30 = arith.constant dense<0.000000e+00> : vector<8x128xf32>
    %72 = tpu.matmul %71, %1, %cst_30 {dimension_numbers = #tpu.dot_dimension_numbers<[1], [0], [0], [1], [0, 0, 1, 1], [], []>} : vector<8x64xf32>, vector<64x128xf32>, vector<8x128xf32> -> vector<8x128xf32>
    %73 = vector.broadcast %3 : vector<1x128xf32> to vector<8x128xf32>
    %74 = arith.addf %72, %73 : vector<8x128xf32>
    %75 = vector.extract_strided_slice %74 {offsets = [0, 0], sizes = [8, 32], strides = [1, 1]} : vector<8x128xf32> to vector<8x32xf32>
    %76 = arith.negf %75 : vector<8x32xf32>
    %77 = math.exp %76 : vector<8x32xf32>
    %cst_31 = arith.constant 1.000000e+00 : f32
    %78 = vector.broadcast %cst_31 : f32 to vector<8x32xf32>
    %79 = arith.addf %78, %77 : vector<8x32xf32>
    %80 = arith.divf %78, %79 : vector<8x32xf32>
    %81 = vector.extract_strided_slice %74 {offsets = [0, 32], sizes = [8, 32], strides = [1, 1]} : vector<8x128xf32> to vector<8x32xf32>
    %82 = arith.negf %81 : vector<8x32xf32>
    %83 = math.exp %82 : vector<8x32xf32>
    %cst_32 = arith.constant 1.000000e+00 : f32
    %84 = vector.broadcast %cst_32 : f32 to vector<8x32xf32>
    %85 = arith.addf %84, %83 : vector<8x32xf32>
    %86 = arith.divf %84, %85 : vector<8x32xf32>
    %87 = vector.extract_strided_slice %74 {offsets = [0, 64], sizes = [8, 32], strides = [1, 1]} : vector<8x128xf32> to vector<8x32xf32>
    %88 = math.tanh %87 : vector<8x32xf32>
    %89 = vector.extract_strided_slice %74 {offsets = [0, 96], sizes = [8, 32], strides = [1, 1]} : vector<8x128xf32> to vector<8x32xf32>
    %90 = arith.negf %89 : vector<8x32xf32>
    %91 = math.exp %90 : vector<8x32xf32>
    %cst_33 = arith.constant 1.000000e+00 : f32
    %92 = vector.broadcast %cst_33 : f32 to vector<8x32xf32>
    %93 = arith.addf %92, %91 : vector<8x32xf32>
    %94 = arith.divf %92, %93 : vector<8x32xf32>
    %95 = arith.mulf %86, %37 : vector<8x32xf32>
    %96 = arith.mulf %80, %88 : vector<8x32xf32>
    %97 = arith.addf %95, %96 : vector<8x32xf32>
    %98 = math.tanh %97 : vector<8x32xf32>
    %99 = arith.mulf %94, %98 : vector<8x32xf32>
    %100 = tpu.concatenate %99, %68 in 1 : vector<8x32xf32>, vector<8x32xf32> -> vector<8x64xf32>
    %cst_34 = arith.constant dense<0.000000e+00> : vector<8x128xf32>
    %101 = tpu.matmul %100, %5, %cst_34 {dimension_numbers = #tpu.dot_dimension_numbers<[1], [0], [0], [1], [0, 0, 1, 1], [], []>} : vector<8x64xf32>, vector<64x128xf32>, vector<8x128xf32> -> vector<8x128xf32>
    %102 = vector.broadcast %7 : vector<1x128xf32> to vector<8x128xf32>
    %103 = arith.addf %101, %102 : vector<8x128xf32>
    %104 = vector.extract_strided_slice %103 {offsets = [0, 0], sizes = [8, 32], strides = [1, 1]} : vector<8x128xf32> to vector<8x32xf32>
    %105 = arith.negf %104 : vector<8x32xf32>
    %106 = math.exp %105 : vector<8x32xf32>
    %cst_35 = arith.constant 1.000000e+00 : f32
    %107 = vector.broadcast %cst_35 : f32 to vector<8x32xf32>
    %108 = arith.addf %107, %106 : vector<8x32xf32>
    %109 = arith.divf %107, %108 : vector<8x32xf32>
    %110 = vector.extract_strided_slice %103 {offsets = [0, 32], sizes = [8, 32], strides = [1, 1]} : vector<8x128xf32> to vector<8x32xf32>
    %111 = arith.negf %110 : vector<8x32xf32>
    %112 = math.exp %111 : vector<8x32xf32>
    %cst_36 = arith.constant 1.000000e+00 : f32
    %113 = vector.broadcast %cst_36 : f32 to vector<8x32xf32>
    %114 = arith.addf %113, %112 : vector<8x32xf32>
    %115 = arith.divf %113, %114 : vector<8x32xf32>
    %116 = vector.extract_strided_slice %103 {offsets = [0, 64], sizes = [8, 32], strides = [1, 1]} : vector<8x128xf32> to vector<8x32xf32>
    %117 = math.tanh %116 : vector<8x32xf32>
    %118 = vector.extract_strided_slice %103 {offsets = [0, 96], sizes = [8, 32], strides = [1, 1]} : vector<8x128xf32> to vector<8x32xf32>
    %119 = arith.negf %118 : vector<8x32xf32>
    %120 = math.exp %119 : vector<8x32xf32>
    %cst_37 = arith.constant 1.000000e+00 : f32
    %121 = vector.broadcast %cst_37 : f32 to vector<8x32xf32>
    %122 = arith.addf %121, %120 : vector<8x32xf32>
    %123 = arith.divf %121, %122 : vector<8x32xf32>
    %124 = arith.mulf %115, %66 : vector<8x32xf32>
    %125 = arith.mulf %109, %117 : vector<8x32xf32>
    %126 = arith.addf %124, %125 : vector<8x32xf32>
    %127 = math.tanh %126 : vector<8x32xf32>
    %128 = arith.mulf %123, %127 : vector<8x32xf32>
    %c1_38 = arith.constant 1 : index
    %c0_39 = arith.constant 0 : index
    %c0_40 = arith.constant 0 : index
    %c0_41 = arith.constant 0 : index
    %129 = vector.load %arg1[%c1_38, %c0_39, %c0_40, %c0_41] : memref<2x2x64x128xf32, #tpu.memory_space<vmem>>, vector<1x1x64x128xf32>
    %130 = vector.shape_cast %129 : vector<1x1x64x128xf32> to vector<64x128xf32>
    %c1_42 = arith.constant 1 : index
    %c0_43 = arith.constant 0 : index
    %c0_44 = arith.constant 0 : index
    %c0_45 = arith.constant 0 : index
    %131 = vector.load %arg2[%c1_42, %c0_43, %c0_44, %c0_45] : memref<2x2x1x128xf32, #tpu.memory_space<vmem>>, vector<1x1x1x128xf32>
    %132 = vector.shape_cast %131 : vector<1x1x1x128xf32> to vector<1x128xf32>
    %c1_46 = arith.constant 1 : index
    %c1_47 = arith.constant 1 : index
    %c0_48 = arith.constant 0 : index
    %c0_49 = arith.constant 0 : index
    %133 = vector.load %arg1[%c1_46, %c1_47, %c0_48, %c0_49] : memref<2x2x64x128xf32, #tpu.memory_space<vmem>>, vector<1x1x64x128xf32>
    %134 = vector.shape_cast %133 : vector<1x1x64x128xf32> to vector<64x128xf32>
    %c1_50 = arith.constant 1 : index
    %c1_51 = arith.constant 1 : index
    %c0_52 = arith.constant 0 : index
    %c0_53 = arith.constant 0 : index
    %135 = vector.load %arg2[%c1_50, %c1_51, %c0_52, %c0_53] : memref<2x2x1x128xf32, #tpu.memory_space<vmem>>, vector<1x1x1x128xf32>
    %136 = vector.shape_cast %135 : vector<1x1x1x128xf32> to vector<1x128xf32>
    %cst_54 = arith.constant 0.000000e+00 : f32
    %137 = vector.broadcast %cst_54 : f32 to vector<8x32xf32>
    %c1_55 = arith.constant 1 : index
    %c0_56 = arith.constant 0 : index
    %c0_57 = arith.constant 0 : index
    %c0_58 = arith.constant 0 : index
    %138 = vector.load %arg0[%c1_55, %c0_56, %c0_57, %c0_58] : memref<2x2x8x32xf32, #tpu.memory_space<vmem>>, vector<1x1x8x32xf32>
    %139 = vector.shape_cast %138 : vector<1x1x8x32xf32> to vector<8x32xf32>
    %140 = tpu.concatenate %139, %137 in 1 : vector<8x32xf32>, vector<8x32xf32> -> vector<8x64xf32>
    %cst_59 = arith.constant dense<0.000000e+00> : vector<8x128xf32>
    %141 = tpu.matmul %140, %130, %cst_59 {dimension_numbers = #tpu.dot_dimension_numbers<[1], [0], [0], [1], [0, 0, 1, 1], [], []>} : vector<8x64xf32>, vector<64x128xf32>, vector<8x128xf32> -> vector<8x128xf32>
    %142 = vector.broadcast %132 : vector<1x128xf32> to vector<8x128xf32>
    %143 = arith.addf %141, %142 : vector<8x128xf32>
    %144 = vector.extract_strided_slice %143 {offsets = [0, 0], sizes = [8, 32], strides = [1, 1]} : vector<8x128xf32> to vector<8x32xf32>
    %145 = arith.negf %144 : vector<8x32xf32>
    %146 = math.exp %145 : vector<8x32xf32>
    %cst_60 = arith.constant 1.000000e+00 : f32
    %147 = vector.broadcast %cst_60 : f32 to vector<8x32xf32>
    %148 = arith.addf %147, %146 : vector<8x32xf32>
    %149 = arith.divf %147, %148 : vector<8x32xf32>
    %150 = vector.extract_strided_slice %143 {offsets = [0, 32], sizes = [8, 32], strides = [1, 1]} : vector<8x128xf32> to vector<8x32xf32>
    %151 = arith.negf %150 : vector<8x32xf32>
    %152 = math.exp %151 : vector<8x32xf32>
    %cst_61 = arith.constant 1.000000e+00 : f32
    %153 = vector.broadcast %cst_61 : f32 to vector<8x32xf32>
    %154 = arith.addf %153, %152 : vector<8x32xf32>
    %155 = arith.divf %153, %154 : vector<8x32xf32>
    %156 = vector.extract_strided_slice %143 {offsets = [0, 64], sizes = [8, 32], strides = [1, 1]} : vector<8x128xf32> to vector<8x32xf32>
    %157 = math.tanh %156 : vector<8x32xf32>
    %158 = vector.extract_strided_slice %143 {offsets = [0, 96], sizes = [8, 32], strides = [1, 1]} : vector<8x128xf32> to vector<8x32xf32>
    %159 = arith.negf %158 : vector<8x32xf32>
    %160 = math.exp %159 : vector<8x32xf32>
    %cst_62 = arith.constant 1.000000e+00 : f32
    %161 = vector.broadcast %cst_62 : f32 to vector<8x32xf32>
    %162 = arith.addf %161, %160 : vector<8x32xf32>
    %163 = arith.divf %161, %162 : vector<8x32xf32>
    %164 = arith.mulf %155, %137 : vector<8x32xf32>
    %165 = arith.mulf %149, %157 : vector<8x32xf32>
    %166 = arith.addf %164, %165 : vector<8x32xf32>
    %167 = math.tanh %166 : vector<8x32xf32>
    %168 = arith.mulf %163, %167 : vector<8x32xf32>
    %169 = tpu.concatenate %168, %137 in 1 : vector<8x32xf32>, vector<8x32xf32> -> vector<8x64xf32>
    %cst_63 = arith.constant dense<0.000000e+00> : vector<8x128xf32>
    %170 = tpu.matmul %169, %134, %cst_63 {dimension_numbers = #tpu.dot_dimension_numbers<[1], [0], [0], [1], [0, 0, 1, 1], [], []>} : vector<8x64xf32>, vector<64x128xf32>, vector<8x128xf32> -> vector<8x128xf32>
    %171 = vector.broadcast %136 : vector<1x128xf32> to vector<8x128xf32>
    %172 = arith.addf %170, %171 : vector<8x128xf32>
    %173 = vector.extract_strided_slice %172 {offsets = [0, 0], sizes = [8, 32], strides = [1, 1]} : vector<8x128xf32> to vector<8x32xf32>
    %174 = arith.negf %173 : vector<8x32xf32>
    %175 = math.exp %174 : vector<8x32xf32>
    %cst_64 = arith.constant 1.000000e+00 : f32
    %176 = vector.broadcast %cst_64 : f32 to vector<8x32xf32>
    %177 = arith.addf %176, %175 : vector<8x32xf32>
    %178 = arith.divf %176, %177 : vector<8x32xf32>
    %179 = vector.extract_strided_slice %172 {offsets = [0, 32], sizes = [8, 32], strides = [1, 1]} : vector<8x128xf32> to vector<8x32xf32>
    %180 = arith.negf %179 : vector<8x32xf32>
    %181 = math.exp %180 : vector<8x32xf32>
    %cst_65 = arith.constant 1.000000e+00 : f32
    %182 = vector.broadcast %cst_65 : f32 to vector<8x32xf32>
    %183 = arith.addf %182, %181 : vector<8x32xf32>
    %184 = arith.divf %182, %183 : vector<8x32xf32>
    %185 = vector.extract_strided_slice %172 {offsets = [0, 64], sizes = [8, 32], strides = [1, 1]} : vector<8x128xf32> to vector<8x32xf32>
    %186 = math.tanh %185 : vector<8x32xf32>
    %187 = vector.extract_strided_slice %172 {offsets = [0, 96], sizes = [8, 32], strides = [1, 1]} : vector<8x128xf32> to vector<8x32xf32>
    %188 = arith.negf %187 : vector<8x32xf32>
    %189 = math.exp %188 : vector<8x32xf32>
    %cst_66 = arith.constant 1.000000e+00 : f32
    %190 = vector.broadcast %cst_66 : f32 to vector<8x32xf32>
    %191 = arith.addf %190, %189 : vector<8x32xf32>
    %192 = arith.divf %190, %191 : vector<8x32xf32>
    %193 = arith.mulf %184, %137 : vector<8x32xf32>
    %194 = arith.mulf %178, %186 : vector<8x32xf32>
    %195 = arith.addf %193, %194 : vector<8x32xf32>
    %196 = math.tanh %195 : vector<8x32xf32>
    %197 = arith.mulf %192, %196 : vector<8x32xf32>
    %c1_67 = arith.constant 1 : index
    %c1_68 = arith.constant 1 : index
    %c0_69 = arith.constant 0 : index
    %c0_70 = arith.constant 0 : index
    %198 = vector.load %arg0[%c1_67, %c1_68, %c0_69, %c0_70] : memref<2x2x8x32xf32, #tpu.memory_space<vmem>>, vector<1x1x8x32xf32>
    %199 = vector.shape_cast %198 : vector<1x1x8x32xf32> to vector<8x32xf32>
    %200 = tpu.concatenate %199, %168 in 1 : vector<8x32xf32>, vector<8x32xf32> -> vector<8x64xf32>
    %cst_71 = arith.constant dense<0.000000e+00> : vector<8x128xf32>
    %201 = tpu.matmul %200, %130, %cst_71 {dimension_numbers = #tpu.dot_dimension_numbers<[1], [0], [0], [1], [0, 0, 1, 1], [], []>} : vector<8x64xf32>, vector<64x128xf32>, vector<8x128xf32> -> vector<8x128xf32>
    %202 = vector.broadcast %132 : vector<1x128xf32> to vector<8x128xf32>
    %203 = arith.addf %201, %202 : vector<8x128xf32>
    %204 = vector.extract_strided_slice %203 {offsets = [0, 0], sizes = [8, 32], strides = [1, 1]} : vector<8x128xf32> to vector<8x32xf32>
    %205 = arith.negf %204 : vector<8x32xf32>
    %206 = math.exp %205 : vector<8x32xf32>
    %cst_72 = arith.constant 1.000000e+00 : f32
    %207 = vector.broadcast %cst_72 : f32 to vector<8x32xf32>
    %208 = arith.addf %207, %206 : vector<8x32xf32>
    %209 = arith.divf %207, %208 : vector<8x32xf32>
    %210 = vector.extract_strided_slice %203 {offsets = [0, 32], sizes = [8, 32], strides = [1, 1]} : vector<8x128xf32> to vector<8x32xf32>
    %211 = arith.negf %210 : vector<8x32xf32>
    %212 = math.exp %211 : vector<8x32xf32>
    %cst_73 = arith.constant 1.000000e+00 : f32
    %213 = vector.broadcast %cst_73 : f32 to vector<8x32xf32>
    %214 = arith.addf %213, %212 : vector<8x32xf32>
    %215 = arith.divf %213, %214 : vector<8x32xf32>
    %216 = vector.extract_strided_slice %203 {offsets = [0, 64], sizes = [8, 32], strides = [1, 1]} : vector<8x128xf32> to vector<8x32xf32>
    %217 = math.tanh %216 : vector<8x32xf32>
    %218 = vector.extract_strided_slice %203 {offsets = [0, 96], sizes = [8, 32], strides = [1, 1]} : vector<8x128xf32> to vector<8x32xf32>
    %219 = arith.negf %218 : vector<8x32xf32>
    %220 = math.exp %219 : vector<8x32xf32>
    %cst_74 = arith.constant 1.000000e+00 : f32
    %221 = vector.broadcast %cst_74 : f32 to vector<8x32xf32>
    %222 = arith.addf %221, %220 : vector<8x32xf32>
    %223 = arith.divf %221, %222 : vector<8x32xf32>
    %224 = arith.mulf %215, %166 : vector<8x32xf32>
    %225 = arith.mulf %209, %217 : vector<8x32xf32>
    %226 = arith.addf %224, %225 : vector<8x32xf32>
    %227 = math.tanh %226 : vector<8x32xf32>
    %228 = arith.mulf %223, %227 : vector<8x32xf32>
    %229 = tpu.concatenate %228, %197 in 1 : vector<8x32xf32>, vector<8x32xf32> -> vector<8x64xf32>
    %cst_75 = arith.constant dense<0.000000e+00> : vector<8x128xf32>
    %230 = tpu.matmul %229, %134, %cst_75 {dimension_numbers = #tpu.dot_dimension_numbers<[1], [0], [0], [1], [0, 0, 1, 1], [], []>} : vector<8x64xf32>, vector<64x128xf32>, vector<8x128xf32> -> vector<8x128xf32>
    %231 = vector.broadcast %136 : vector<1x128xf32> to vector<8x128xf32>
    %232 = arith.addf %230, %231 : vector<8x128xf32>
    %233 = vector.extract_strided_slice %232 {offsets = [0, 0], sizes = [8, 32], strides = [1, 1]} : vector<8x128xf32> to vector<8x32xf32>
    %234 = arith.negf %233 : vector<8x32xf32>
    %235 = math.exp %234 : vector<8x32xf32>
    %cst_76 = arith.constant 1.000000e+00 : f32
    %236 = vector.broadcast %cst_76 : f32 to vector<8x32xf32>
    %237 = arith.addf %236, %235 : vector<8x32xf32>
    %238 = arith.divf %236, %237 : vector<8x32xf32>
    %239 = vector.extract_strided_slice %232 {offsets = [0, 32], sizes = [8, 32], strides = [1, 1]} : vector<8x128xf32> to vector<8x32xf32>
    %240 = arith.negf %239 : vector<8x32xf32>
    %241 = math.exp %240 : vector<8x32xf32>
    %cst_77 = arith.constant 1.000000e+00 : f32
    %242 = vector.broadcast %cst_77 : f32 to vector<8x32xf32>
    %243 = arith.addf %242, %241 : vector<8x32xf32>
    %244 = arith.divf %242, %243 : vector<8x32xf32>
    %245 = vector.extract_strided_slice %232 {offsets = [0, 64], sizes = [8, 32], strides = [1, 1]} : vector<8x128xf32> to vector<8x32xf32>
    %246 = math.tanh %245 : vector<8x32xf32>
    %247 = vector.extract_strided_slice %232 {offsets = [0, 96], sizes = [8, 32], strides = [1, 1]} : vector<8x128xf32> to vector<8x32xf32>
    %248 = arith.negf %247 : vector<8x32xf32>
    %249 = math.exp %248 : vector<8x32xf32>
    %cst_78 = arith.constant 1.000000e+00 : f32
    %250 = vector.broadcast %cst_78 : f32 to vector<8x32xf32>
    %251 = arith.addf %250, %249 : vector<8x32xf32>
    %252 = arith.divf %250, %251 : vector<8x32xf32>
    %253 = arith.mulf %244, %195 : vector<8x32xf32>
    %254 = arith.mulf %238, %246 : vector<8x32xf32>
    %255 = arith.addf %253, %254 : vector<8x32xf32>
    %256 = math.tanh %255 : vector<8x32xf32>
    %257 = arith.mulf %252, %256 : vector<8x32xf32>
    %258 = tpu.concatenate %128, %257 in 1 : vector<8x32xf32>, vector<8x32xf32> -> vector<8x64xf32>
    %c0_79 = arith.constant 0 : index
    %c0_80 = arith.constant 0 : index
    %259 = vector.load %arg3[%c0_79, %c0_80] : memref<64x8xf32, #tpu.memory_space<vmem>>, vector<64x8xf32>
    %cst_81 = arith.constant dense<0.000000e+00> : vector<8x8xf32>
    %260 = tpu.matmul %258, %259, %cst_81 {dimension_numbers = #tpu.dot_dimension_numbers<[1], [0], [0], [1], [0, 0, 1, 1], [], []>} : vector<8x64xf32>, vector<64x8xf32>, vector<8x8xf32> -> vector<8x8xf32>
    %c0_82 = arith.constant 0 : index
    %c0_83 = arith.constant 0 : index
    %261 = vector.load %arg4[%c0_82, %c0_83] : memref<1x8xf32, #tpu.memory_space<vmem>>, vector<1x8xf32>
    %262 = vector.broadcast %261 : vector<1x8xf32> to vector<8x8xf32>
    %263 = arith.addf %260, %262 : vector<8x8xf32>
    %cst_84 = arith.constant 0.000000e+00 : f32
    %264 = vector.broadcast %cst_84 : f32 to vector<8x8xf32>
    %265 = arith.maximumf %263, %264 : vector<8x8xf32>
    %c0_85 = arith.constant 0 : index
    %c0_86 = arith.constant 0 : index
    %266 = vector.load %arg5[%c0_85, %c0_86] : memref<8x1xf32, #tpu.memory_space<vmem>>, vector<8x1xf32>
    %cst_87 = arith.constant dense<0.000000e+00> : vector<8x1xf32>
    %267 = tpu.matmul %265, %266, %cst_87 {dimension_numbers = #tpu.dot_dimension_numbers<[1], [0], [0], [1], [0, 0, 1, 1], [], []>} : vector<8x8xf32>, vector<8x1xf32>, vector<8x1xf32> -> vector<8x1xf32>
    %c0_88 = arith.constant 0 : index
    %c0_89 = arith.constant 0 : index
    %268 = vector.load %arg6[%c0_88, %c0_89] : memref<1x1xf32, #tpu.memory_space<vmem>>, vector<1x1xf32>
    %269 = vector.broadcast %268 : vector<1x1xf32> to vector<8x1xf32>
    %270 = arith.addf %267, %269 : vector<8x1xf32>
    %c0_90 = arith.constant 0 : index
    %c0_91 = arith.constant 0 : index
    %271 = vector.load %arg7[%c0_90, %c0_91] : memref<8x1xf32, #tpu.memory_space<vmem>>, vector<8x1xf32>
    tpu.vector_store %arg7[%c0_90, %c0_91], %270 {strides = array<i32>} : memref<8x1xf32, #tpu.memory_space<vmem>>, vector<8x1xf32>,
    return
  }
}

</mosaic_0001>

<bundles_post_ra>
// kernel: prognosis_model_d_forward.2
= control target key start
LH: loop header
LB: loop body
LE: loop exit
PB: predicated region body
PF: predicated region fallthrough
CT: control target
= control target key end

     0   :  { %s1026_s18 = smov 0   ;;  %s1028_s19 = smov 0   ;;  %s1124_s0 = inlined_call_operand.vmem [shape: f32[2,4,64,9], index: 0, kind: input, shape index: {}]   ;;  %s1125_s1 = inlined_call_operand.vmem [shape: f32[2,9,32], index: 1, kind: input, shape index: {}]   ;;  %s1126_s2 = inlined_call_operand.vmem [shape: f32[2,1,32], index: 2, kind: input, shape index: {}]   ;;  %s1127_s3 = inlined_call_operand.vmem [shape: f32[2,32,32], index: 3, kind: input, shape index: {}]   ;;  %s1128_s4 = inlined_call_operand.vmem [shape: f32[2,1,32], index: 4, kind: input, shape index: {}]   ;;  %s1129_s5 = inlined_call_operand.vmem [shape: f32[2,4,1,32], index: 5, kind: output, shape index: {}]  }
   0x1   :  { %s1030_s20 = smov 0   ;;  %s1032_s21 = smov 0  }
   0x2   :  { %s1034_s22 = smov 0  }
   0x3 LB: > { %s30_s23 = sadd.s32 1, %s984_s20  ;;  %s34_s24 = sadd.s32 1, %s988_s21  ;;  %s992_s22 = sphi %s1034_s22, %s15_s22   ;;  %s988_s21 = sphi %s1032_s21, %s1133_s21   ;;  %s984_s20 = sphi %s1030_s20, %s1132_s20   ;;  %s980_s19 = sphi %s1028_s19, %s1131_s19   ;;  %s976_s18 = sphi %s1026_s18, %s1130_s18  }
   0x4   : > { %p32_p0 = scmp.ge.s32.totalorder %s30_s23, 4  ;;  %p806_p1 = scmp.ge.s32.totalorder %s992_s22, 1 }
   0x5   : > { %p257_p2 = scmp.lt.s32.totalorder %s992_s22, 9 }
   0x6   : > { %s1135_s23 = smov (%p32_p0, %s30_s23), 0  ;;  %s1137_s24 = smov (!%p32_p0, %s34_s24), %s988_s21 }
   0x7   : > { %p258_p3 = pnand %p806_p1, %p257_p2  ;;  %p36_p4 = scmp.ge.s32.totalorder %s1137_s24, 2 }
   0x8   : > { %p312_p5 = scmp.lt.s32.totalorder (!%p258_p3), %s980_s19, 1  ;;  %p314_p6 = scmp.lt.s32.totalorder (!%p258_p3), %s976_s18, 3 }
   0x9   : > { %s1139_s24 = smov (%p36_p4, %s1137_s24), 0  ;;  %261 = sbr.rel (%p258_p3) target bundleno = 490 (0x1ea), region = 40 }
   0xe   : > { %s1141_s19 = smov (!%p312_p5, %s980_s19), 1  ;;  %s1143_s18 = smov (!%p314_p6, %s976_s18), 3  ;;  %vm396_vm0 = vcmask 1040384   ;;  %vm371_vm1 = vcmask 72704   ;;  %vm352_vm2 = vcmask 253952   ;;  %v994_v10 = vmov 0.0  }
   0xf   : > { %s836_s25 = sshll.u32 %s1141_s19, 4  ;;  %s808_s26 = sshll.u32 %s1141_s19, 5  ;;  %353 = vst.msk [vmem:[#allocation2] sm:$0x1] %vm352_vm2, %v994_v10  ;;  %869 = vmatprep.subr.mxu1 %v994_v10  ;;  %vm995_vm3 = vmmov 0   ;;  %vm562_vm4 = vcmask 261120  }
  0x10   : > { %s329_s29 = scalar_lea.vmem %s1125_s1, %s836_s25  ;;  %s807_s30 = sshll.u32 %s1143_s18, 3  ;;  %877 = vmatprep.mubr.msk.f32.mxu1 %vm995_vm3, %v994_v10 }
  0x11   : > { %v363_v0 = vld [vmem:[%s329_s29 + $0x8] sm:$0x1]  ;;  %v362_v1 = vld [vmem:[%s329_s29] sm:$0xff]  ;;  %s321_s6 = sadd.s32 %s808_s26, %s807_s30  ;;  %s337_s13 = scalar_lea.vmem %s1127_s3, %s808_s26 }
  0x12   : > { %853 = vmatprep.subr.msk.mxu0 %vm396_vm0, %v363_v0  ;;  %s809_s7 = sshll.u32 %s321_s6, 3  ;;  %v595_v11 = vld [vmem:[%s337_s13 + $0x18] sm:$0xff]  ;;  %v594_v12 = vld [vmem:[%s337_s13 + $0x10] sm:$0xff]  ;;  %v593_v13 = vld [vmem:[%s337_s13 + $0x8] sm:$0xff]  ;;  %s332_s16 = scalar_lea.vmem %s1126_s2, %s1141_s19 }
  0x13   : > { %854 = vmatpush3.msk.msra.mxu0 %vm396_vm0, %v363_v0  ;;  %s323_s10 = scalar_lea.vmem %s1124_s0, %s809_s7  ;;  %870 = vmatpush3.msra.mxu1 %v595_v11  ;;  %v592_v14 = vld [vmem:[%s337_s13] sm:$0xff]  ;;  %s814_s17 = sshll.u32 %s1141_s19, 2 }
  0x14   : > { %855 = vmatprep.subr.mxu0 %v362_v1  ;;  %v354_v2 = vld [vmem:[%s323_s10] sm:$0xff]  ;;  %v355_v3 = vld [vmem:[%s323_s10 + $0x8] sm:$0xff]  ;;  %v356_v4 = vld [vmem:[%s323_s10 + $0x10] sm:$0xff]  ;;  %871 = vmatprep.subr.mxu1 %v994_v10  ;;  %s340_s27 = scalar_lea.vmem %s1128_s4, %s1141_s19  ;;  %s346_s28 = sadd.s32 %s814_s17, %s1143_s18 }
  0x15   : > { %856 = vmatpush3.msra.mxu0 %v362_v1  ;;  %857 = vmatprep.mubr.msk.f32.mxu0 %vm371_vm1, %v354_v2  ;;  %v357_v5 = vld [vmem:[%s323_s10 + $0x18] sm:$0xff]  ;;  %v358_v6 = vld [vmem:[%s323_s10 + $0x20] sm:$0xff]  ;;  %v359_v7 = vld [vmem:[%s323_s10 + $0x28] sm:$0xff]  ;;  %s347_s6 = scalar_lea.vmem %s1129_s5, %s346_s28 }
  0x16   : > { %858 = vmatmul.mubr.msk.f32.vlgmr.msra.gmra.mxu0 %vm371_vm1, %v355_v3  ;;  %v360_v8 = vld [vmem:[%s323_s10 + $0x30] sm:$0xff]  ;;  %v361_v9 = vld [vmem:[%s323_s10 + $0x38] sm:$0xff]  ;;  %872 = vmatpush3.msra.mxu1 %v594_v12  ;;  %v815_v15 = vld [vmem:[%s332_s16] ss:$0 sm:$0xff] }
  0x17   : > { %860 = vmatprep.mubr.msk.f32.mxu0 %vm371_vm1, %v356_v4  ;;  %873 = vmatprep.subr.mxu1 %v994_v10 }
  0x18   : > { %874 = vmatpush3.msra.mxu1 %v593_v13 }
  0x19   : > { %875 = vmatprep.subr.mxu1 %v994_v10 }
  0x1a   : > { %861 = vmatmul.mubr.msk.f32.gmra.mxu0 %vm371_vm1, %v357_v5  ;;  %876 = vmatpush3.msra.mxu1 %v592_v14 }
  0x1b   : > { %863 = vmatprep.mubr.msk.f32.mxu0 %vm371_vm1, %v358_v6 }
  0x1e   : > { %864 = vmatmul.mubr.msk.f32.gmra.mxu0 %vm371_vm1, %v359_v7 }
  0x1f   : > { %866 = vmatprep.mubr.msk.f32.mxu0 %vm371_vm1, %v360_v8 }
  0x22   : > { %867 = vmatmul.mubr.msk.f32.gmra.mxu0 %vm371_vm1, %v361_v9 }
  0xd6   : > { %v859_v16 = vpop.f32.mrf.mxu0 }
  0xd7   : > { %v472_v17 = vadd.f32 %v859_v16, %v815_v15 }
  0xd8   : > { %v466_v18 = vpop.f32.mrf.mxu0 }
  0xd9   : > { %v826_v19 = vmul.f32 -1.442695, %v472_v17  ;;  %v467_v20 = vadd.f32 %v815_v15, %v466_v18 }
  0xda   : > { %v862_v21 = vpop.f32.mrf.mxu0 }
  0xdb   : > { %922 = vpow2.f32 %v826_v19  ;;  %v825_v22 = vmul.f32 -1.442695, %v467_v20  ;;  %v482_v23 = vadd.f32 %v862_v21, %v815_v15 }
  0xdc   : > { %v476_v24 = vpop.f32.mrf.mxu0 }
  0xdd   : > { %924 = vpow2.f32 %v825_v22  ;;  %v828_v25 = vmul.f32 -1.442695, %v482_v23  ;;  %v477_v26 = vadd.f32 %v815_v15, %v476_v24 }
  0xde   : > { %v865_v27 = vpop.f32.mrf.mxu0 }
  0xdf   : > { %926 = vpow2.f32 %v828_v25  ;;  %v827_v28 = vmul.f32 -1.442695, %v477_v26  ;;  %v492_v29 = vadd.f32 %v865_v27, %v815_v15 }
  0xe0   : > { %v486_v30 = vpop.f32.mrf.mxu0 }
  0xe1   : > { %928 = vpow2.f32 %v827_v28  ;;  %v830_v31 = vmul.f32 -1.442695, %v492_v29  ;;  %v487_v32 = vadd.f32 %v815_v15, %v486_v30  ;;  %v561_v28 = vld [vmem:[#allocation2] sm:$0x1] }
  0xe2   : > { %v868_v33 = vpop.f32.mrf.mxu0 }
  0xe3   : > { %930 = vpow2.f32 %v830_v31  ;;  %v829_v34 = vmul.f32 -1.442695, %v487_v32  ;;  %v502_v35 = vadd.f32 %v868_v33, %v815_v15  ;;  %v596_v33 = vld [vmem:[%s340_s27] sm:$0x1] }
  0xe4   : > { %v496_v36 = vpop.f32.mrf.mxu0 }
  0xe5   : > { %932 = vpow2.f32 %v829_v34  ;;  %v832_v37 = vmul.f32 -1.442695, %v502_v35  ;;  %v497_v38 = vadd.f32 %v815_v15, %v496_v36 }
  0xe7   : > { %934 = vpow2.f32 %v832_v37  ;;  %v831_v39 = vmul.f32 -1.442695, %v497_v38 }
  0xe8   : > { %v923_v40 = vpop.eup %922 }
  0xe9   : > { %v530_v41 = vadd.f32 1.0, %v923_v40  ;;  %936 = vpow2.f32 %v831_v39 }
  0xea   : > { %v925_v42 = vpop.eup %924 }
  0xeb   : > { %938 = vrcp.f32 %v530_v41  ;;  %v529_v43 = vadd.f32 1.0, %v925_v42 }
  0xec   : > { %v927_v44 = vpop.eup %926 }
  0xed   : > { %940 = vrcp.f32 %v529_v43  ;;  %v532_v45 = vadd.f32 1.0, %v927_v44 }
  0xee   : > { %v929_v46 = vpop.eup %928 }
  0xef   : > { %942 = vrcp.f32 %v532_v45  ;;  %v531_v47 = vadd.f32 1.0, %v929_v46 }
  0xf0   : > { %v931_v48 = vpop.eup %930 }
  0xf1   : > { %944 = vrcp.f32 %v531_v47  ;;  %v534_v49 = vadd.f32 1.0, %v931_v48 }
  0xf2   : > { %v933_v50 = vpop.eup %932 }
  0xf3   : > { %946 = vrcp.f32 %v534_v49  ;;  %v533_v51 = vadd.f32 1.0, %v933_v50 }
  0xf4   : > { %v935_v52 = vpop.eup %934 }
  0xf5   : > { %948 = vrcp.f32 %v533_v51  ;;  %v536_v53 = vadd.f32 1.0, %v935_v52 }
  0xf6   : > { %v937_v54 = vpop.eup %936 }
  0xf7   : > { %950 = vrcp.f32 %v536_v53  ;;  %v535_v55 = vadd.f32 1.0, %v937_v54 }
  0xf8   : > { %v939_v56 = vpop.eup %938 }
  0xf9   : > { %952 = vrcp.f32 %v535_v55  ;;  %v554_v58 = vmul.f32 %v939_v56, %v472_v17 }
  0xfa   : > { %v941_v57 = vpop.eup %940 }
  0xfb   : > { %v553_v59 = vmul.f32 %v941_v57, %v467_v20  ;;  %v564_v63 = vsel %vm562_vm4, %v554_v58, 0.0 }
  0xfc   : > { %v943_v60 = vpop.eup %942 }
  0xfd   : > { %v563_v61 = vsel %vm562_vm4, %v553_v59, 0.0  ;;  %v556_v0 = vmul.f32 %v943_v60, %v482_v23 }
  0xfe   : > { %v945_v62 = vpop.eup %944  ;;  %v565_v3 = vadd.f32 %v564_v63, %v563_v61 }
  0xff   : > { %v555_v1 = vmul.f32 %v945_v62, %v477_v26  ;;  %v568_v7 = vsel %vm562_vm4, %v556_v0, 0.0 }
 0x100   : > { %v947_v2 = vpop.eup %946 }
 0x101   : > { %v566_v4 = vsel %vm562_vm4, %v555_v1, 0.0  ;;  %v558_v8 = vmul.f32 %v947_v2, %v492_v29 }
 0x102   : > { %v949_v5 = vpop.eup %948  ;;  %v567_v6 = vadd.f32 %v566_v4, %v565_v3 }
 0x103   : > { %v557_v9 = vmul.f32 %v949_v5, %v487_v32  ;;  %v572_v15 = vsel %vm562_vm4, %v558_v8, 0.0 }
 0x104   : > { %v951_v10 = vpop.eup %950  ;;  %v569_v11 = vadd.f32 %v568_v7, %v567_v6 }
 0x105   : > { %v570_v12 = vsel %vm562_vm4, %v557_v9, 0.0  ;;  %v560_v16 = vmul.f32 %v951_v10, %v502_v35 }
 0x106   : > { %v953_v13 = vpop.eup %952  ;;  %v571_v14 = vadd.f32 %v570_v12, %v569_v11 }
 0x107   : > { %v559_v17 = vmul.f32 %v953_v13, %v497_v38  ;;  %v576_v21 = vsel %vm562_vm4, %v560_v16, 0.0 }
 0x108   : > { %v573_v18 = vadd.f32 %v572_v15, %v571_v14 }
 0x109   : > { %v574_v19 = vsel %vm562_vm4, %v559_v17, 0.0 }
 0x10a   : > { %v575_v20 = vadd.f32 %v574_v19, %v573_v18 }
 0x10c   : > { %v577_v22 = vadd.f32 %v576_v21, %v575_v20 }
 0x10e   : > { %v578_v23 = vrot.slane %v577_v22, 4 }
 0x110   : > { %v579_v24 = vadd.f32 %v578_v23, %v577_v22 }
 0x112   : > { %v580_v25 = vrot.slane %v579_v24, 2 }
 0x114   : > { %v581_v26 = vadd.f32 %v580_v25, %v579_v24 }
 0x116   : > { %v582_v27 = vrot.slane %v581_v26, 1 }
 0x118   : > { %v583_v29 = vadd.f32 %v582_v27, %v581_v26 }
 0x11a   : > { %v584_v30 = vadd.f32 %v583_v29, %v561_v28 }
 0x11c   : > { %586 = vst.msk [vmem:[#allocation2] sm:$0x1] %vm352_vm2, %v584_v30 }
 0x123   : > { %v590_v31 = vld [vmem:[#allocation2] sm:$0x1] }
 0x124   : > { %v591_v32 = vmul.f32 0.015625, %v590_v31 }
 0x126   : > { %878 = vmatmul.mubr.msk.f32.vlgmr.msra.gmra.mxu1 %vm562_vm4, %v591_v32 }
 0x1e6   : > { %v666_v34 = vpop.f32.mrf.mxu1 }
 0x1e7   : > { %v667_v35 = vadd.f32 %v666_v34, %v596_v33 }
 0x1e8   : > { %v879_v36 = vpop.f32.mrf.mxu1 }
 0x1e9   : > { %670 = vst.msk [vmem:[%s347_s6] sm:$0x1] %vm352_vm2, %v667_v35 }
 0x1ea PF: > { %s15_s22 = sadd.s32 1, %s992_s22   ;;  %s1130_s18 = smov %s984_s20 }
 0x1eb   : > { %p12_p7 = scmp.ge.s32.totalorder %s15_s22, 10   ;;  %s1131_s19 = smov %s988_s21 }
 0x1ec   : > { %s1132_s20 = smov %s1135_s23  ;;  %s1133_s21 = smov %s1139_s24 }
 0x1ed   :  { %14 = sbr.rel (!%p12_p7) target bundleno = 3 (0x3), region = 90 }

// kernel: prognosis_model_d_forward.3
= control target key start
LH: loop header
LB: loop body
LE: loop exit
PB: predicated region body
PF: predicated region fallthrough
CT: control target
= control target key end

     0   :  { %v1484_v0 = vmov 0.0   ;;  %vm1485_vm0 = vmmov 0   ;;  %vm49_vm1 = vcmask 261120   ;;  %vm57_vm2 = vcmask 523264   ;;  %s1486_s21 = smov 64   ;;  %s1487_s22 = smov 32   ;;  %s1857_s1 = inlined_call_operand.vmem [shape: f32[2,2,64,128], index: 1, kind: input, shape index: {}]   ;;  %s1858_s0 = inlined_call_operand.vmem [shape: f32[2,2,8,32], index: 0, kind: input, shape index: {}]   ;;  %s1859_s2 = inlined_call_operand.vmem [shape: f32[2,2,1,128], index: 2, kind: input, shape index: {}]   ;;  %s1860_s3 = inlined_call_operand.vmem [shape: f32[64,8], index: 3, kind: input, shape index: {}]   ;;  %s1861_s5 = inlined_call_operand.vmem [shape: f32[8,1], index: 5, kind: input, shape index: {}]   ;;  %s1862_s6 = inlined_call_operand.<no memory space> [shape: f32[1,1], index: 6, kind: input, shape index: {}]   ;;  %s1863_s4 = inlined_call_operand.vmem [shape: f32[1,8], index: 4, kind: input, shape index: {}]   ;;  %s1864_s7 = inlined_call_operand.vmem [shape: f32[8,1], index: 7, kind: output, shape index: {}]  }
   0x1   :  { %1240 = vmatprep.subr.mxu0 %v1484_v0  ;;  %v35_v1 = vld [vmem:[%s1857_s1 + $0x38] sm:$0xff]  ;;  %v34_v2 = vld [vmem:[%s1857_s1 + $0x30] sm:$0xff]  ;;  %1256 = vmatprep.mubr.msk.f32.mxu0 %vm1485_vm0, %v1484_v0  ;;  %v33_v3 = vld [vmem:[%s1857_s1 + $0x28] sm:$0xff]  ;;  %vm1023_vm3 = vcmask 64512   ;;  %vm1097_vm4 = vcmask 7168  }
   0x2   :  { %1241 = vmatpush3.msra.mxu0 %v35_v1  ;;  %1259 = vmatprep.subr.mxu1 %v1484_v0  ;;  %v32_v4 = vld [vmem:[%s1857_s1 + $0x20] sm:$0xff]  ;;  %v31_v5 = vld [vmem:[%s1857_s1 + $0x18] sm:$0xff]  ;;  %v30_v6 = vld [vmem:[%s1857_s1 + $0x10] sm:$0xff] }
   0x3   :  { %1242 = vmatprep.subr.mxu0 %v1484_v0  ;;  %1275 = vmatprep.mubr.msk.f32.mxu1 %vm1485_vm0, %v1484_v0  ;;  %v29_v7 = vld [vmem:[%s1857_s1 + $0x8] sm:$0xff]  ;;  %v48_v8 = vld [vmem:[%s1858_s0] sm:$0xff]  ;;  %v1110_v25 = vld [vmem:[%s1857_s1 + $0x78] sm:$0xff] }
   0x4   :  { %1243 = vmatpush3.msra.mxu0 %v34_v2  ;;  %v28_v9 = vld [vmem:[%s1857_s1] sm:$0xff]  ;;  %v50_v10 = vsel %vm49_vm1, %v48_v8, 0.0  ;;  %v1109_v26 = vld [vmem:[%s1857_s1 + $0x70] sm:$0xff]  ;;  %1260 = vmatpush3.msra.mxu1 %v1110_v25  ;;  %v1108_v27 = vld [vmem:[%s1857_s1 + $0x68] sm:$0xff] }
   0x5   :  { %1244 = vmatprep.subr.mxu0 %v1484_v0  ;;  %v1584_v11 = vld [vmem:[%s1859_s2] ss:$0 sm:$0xff]  ;;  %1261 = vmatprep.subr.mxu1 %v1484_v0  ;;  %v1106_v29 = vld [vmem:[%s1857_s1 + $0x58] sm:$0xff]  ;;  %v1105_v30 = vld [vmem:[%s1857_s1 + $0x50] sm:$0xff] }
   0x6   :  { %1245 = vmatpush3.msra.mxu0 %v33_v3  ;;  %1262 = vmatpush3.msra.mxu1 %v1109_v26  ;;  %v1107_v28 = vld [vmem:[%s1857_s1 + $0x60] sm:$0xff]  ;;  %v1104_v32 = vld [vmem:[%s1857_s1 + $0x48] sm:$0xff]  ;;  %v1130_v39 = vld [vmem:[%s1857_s1 + $0xb8] sm:$0xff] }
   0x7   :  { %1246 = vmatprep.subr.mxu0 %v1484_v0  ;;  %1263 = vmatprep.subr.mxu1 %v1484_v0  ;;  %v1103_v33 = vld [vmem:[%s1857_s1 + $0x40] sm:$0xff]  ;;  %v1118_v36 = vld [vmem:[%s1858_s0 + $0x8] sm:$0xff]  ;;  %v1129_v42 = vld [vmem:[%s1857_s1 + $0xb0] sm:$0xff] }
   0x8   :  { %1247 = vmatpush3.msra.mxu0 %v32_v4  ;;  %1264 = vmatpush3.msra.mxu1 %v1108_v27  ;;  %v1128_v43 = vld [vmem:[%s1857_s1 + $0xa8] sm:$0xff]  ;;  %v1127_v44 = vld [vmem:[%s1857_s1 + $0xa0] sm:$0xff]  ;;  %v1126_v45 = vld [vmem:[%s1857_s1 + $0x98] sm:$0xff] }
   0x9   :  { %1248 = vmatprep.subr.mxu0 %v1484_v0  ;;  %1265 = vmatprep.subr.mxu1 %v1484_v0  ;;  %v1125_v46 = vld [vmem:[%s1857_s1 + $0x90] sm:$0xff]  ;;  %v1124_v47 = vld [vmem:[%s1857_s1 + $0x88] sm:$0xff]  ;;  %v1123_v49 = vld [vmem:[%s1857_s1 + $0x80] sm:$0xff] }
   0xa   :  { %1249 = vmatpush3.msra.mxu0 %v31_v5  ;;  %1266 = vmatpush3.msra.mxu1 %v1107_v28  ;;  %v1141_v48 = vld [vmem:[%s1858_s0 + $0x10] sm:$0xff]  ;;  %v1696_v51 = vld [vmem:[%s1859_s2 + $0x1] ss:$0 sm:$0xff]  ;;  %v1703_v58 = vld [vmem:[%s1859_s2 + $0x2] ss:$0 sm:$0xff] }
   0xb   :  { %1250 = vmatprep.subr.mxu0 %v1484_v0  ;;  %1267 = vmatprep.subr.mxu1 %v1484_v0  ;;  %v496_v50 = vsel %vm49_vm1, %v1141_v48, 0.0  ;;  %v1148_v48 = vld [vmem:[%s1858_s0 + $0x18] sm:$0xff] }
   0xc   :  { %1251 = vmatpush3.msra.mxu0 %v30_v6  ;;  %1268 = vmatpush3.msra.mxu1 %v1106_v29 }
   0xd   :  { %1252 = vmatprep.subr.mxu0 %v1484_v0  ;;  %1269 = vmatprep.subr.mxu1 %v1484_v0 }
   0xe   :  { %1253 = vmatpush3.msra.mxu0 %v29_v7  ;;  %1270 = vmatpush3.msra.mxu1 %v1105_v30 }
   0xf   :  { %1254 = vmatprep.subr.mxu0 %v1484_v0  ;;  %1271 = vmatprep.subr.mxu1 %v1484_v0 }
  0x10   :  { %1255 = vmatpush3.msra.mxu0 %v28_v9  ;;  %1272 = vmatpush3.msra.mxu1 %v1104_v32 }
  0x11   :  { %1257 = vmatmul.mubr.msk.f32.vlgmr.msra.gmra.mxu0 %vm57_vm2, %v50_v10  ;;  %1278 = vmatprep.subr.mxu0 %v1484_v0 }
  0x12   :  { %1279 = vmatpush3.msra.mxu0 %v35_v1  ;;  %1294 = vmatprep.mubr.msk.f32.mxu0 %vm1485_vm0, %v1484_v0 }
  0x13   :  { %1280 = vmatprep.subr.mxu0 %v1484_v0  ;;  %1273 = vmatprep.subr.mxu1 %v1484_v0 }
  0x14   :  { %1281 = vmatpush3.msra.mxu0 %v34_v2  ;;  %1274 = vmatpush3.msra.mxu1 %v1103_v33 }
  0x15   :  { %1282 = vmatprep.subr.mxu0 %v1484_v0  ;;  %1297 = vmatprep.subr.mxu1 %v1484_v0 }
  0x16   :  { %1283 = vmatpush3.msra.mxu0 %v33_v3 }
  0x17   :  { %1284 = vmatprep.subr.mxu0 %v1484_v0 }
  0x18   :  { %1285 = vmatpush3.msra.mxu0 %v32_v4 }
  0x19   :  { %1286 = vmatprep.subr.mxu0 %v1484_v0 }
  0x1a   :  { %1287 = vmatpush3.msra.mxu0 %v31_v5 }
  0x1b   :  { %1288 = vmatprep.subr.mxu0 %v1484_v0 }
  0x1c   :  { %1289 = vmatpush3.msra.mxu0 %v30_v6 }
  0x1d   :  { %1290 = vmatprep.subr.mxu0 %v1484_v0 }
  0x1e   :  { %1291 = vmatpush3.msra.mxu0 %v29_v7 }
  0x1f   :  { %1292 = vmatprep.subr.mxu0 %v1484_v0 }
  0x20   :  { %1293 = vmatpush3.msra.mxu0 %v28_v9 }
  0x21   :  { %1316 = vmatprep.subr.mxu0 %v1484_v0 }
  0xd1   :  { %v127_v12 = vpop.f32.mrf.mxu0 }
  0xd2   :  { %v128_v13 = vadd.f32 %v1584_v11, %v127_v12 }
  0xd3   :  { %v1258_v14 = vpop.f32.mrf.mxu0 }
  0xd4   :  { %1420 = vtanh.f32 %v128_v13  ;;  %v1114_v16 = vmul.f32 -1.442695, %v128_v13 }
  0xd6   :  { %1422 = vpow2.f32 %v1114_v16 }
  0xe1   :  { %v1421_v15 = vpop.eup %1420 }
  0xe2   :  { %140 = vrot.lane.b32.xlu0 %v1421_v15, %s1486_s21 }
  0xe3   :  { %v1423_v17 = vpop.eup %1422 }
  0xe4   :  { %v134_v18 = vadd.f32 1.0, %v1423_v17 }
  0xe6   :  { %1424 = vrcp.f32 %v134_v18 }
  0xf3   :  { %v1425_v19 = vpop.eup %1424 }
  0xf4   :  { %v138_v22 = vmul.f32 0.0, %v1425_v19 }
 0x154   :  { %v141_v20 = vpop.permute.xlu0 %140 }
 0x155   :  { %v143_v21 = vmul.f32 %v1425_v19, %v141_v20 }
 0x157   :  { %145 = vrot.lane.b32.xlu0 %v143_v21, %s1487_s22 }
 0x1c9   :  { %v146_v23 = vpop.permute.xlu0 %145 }
 0x1ca   :  { %v1589_v24 = vadd.f32 %v146_v23, %v138_v22 }
 0x1cc   :  { %1426 = vtanh.f32 %v1589_v24 }
 0x1d9   :  { %v1427_v31 = vpop.eup %1426 }
 0x1da   :  { %151 = vrot.lane.b32.xlu1 %v1427_v31, %s1486_s21 }
 0x24c   :  { %v152_v34 = vpop.permute.xlu1 %151 }
 0x24d   :  { %v154_v35 = vmul.f32 %v1425_v19, %v152_v34 }
 0x24f   :  { %265 = vrot.lane.b32.xlu0 %v154_v35, %s1486_s21  ;;  %156 = vrot.lane.b32.xlu1 %v154_v35, %s1487_s22 }
 0x2c1   :  { %v266_v37 = vpop.permute.xlu0 %265  ;;  %v157_v38 = vpop.permute.xlu1 %156 }
 0x2c2   :  { %v268_v40 = vsel %vm49_vm1, %v1118_v36, %v266_v37  ;;  %v159_v41 = vsel %vm49_vm1, %v157_v38, 0.0 }
 0x2c3   :  { %1276 = vmatmul.mubr.msk.f32.vlgmr.msra.gmra.mxu1 %vm57_vm2, %v159_v41  ;;  %1295 = vmatmul.mubr.msk.f32.vlgmr.msra.gmra.mxu0 %vm57_vm2, %v268_v40  ;;  %v1139_v40 = vld [vmem:[%s1857_s1 + $0xf8] sm:$0xff] }
 0x2c4   :  { %1317 = vmatpush3.msra.mxu0 %v1130_v39  ;;  %1332 = vmatprep.mubr.msk.f32.mxu0 %vm1485_vm0, %v1484_v0 }
 0x2c5   :  { %1318 = vmatprep.subr.mxu0 %v1484_v0  ;;  %1298 = vmatpush3.msra.mxu1 %v1110_v25 }
 0x2c6   :  { %1319 = vmatpush3.msra.mxu0 %v1129_v42  ;;  %1299 = vmatprep.subr.mxu1 %v1484_v0 }
 0x2c7   :  { %1320 = vmatprep.subr.mxu0 %v1484_v0  ;;  %1300 = vmatpush3.msra.mxu1 %v1109_v26 }
 0x2c8   :  { %1321 = vmatpush3.msra.mxu0 %v1128_v43  ;;  %1301 = vmatprep.subr.mxu1 %v1484_v0 }
 0x2c9   :  { %1322 = vmatprep.subr.mxu0 %v1484_v0  ;;  %1302 = vmatpush3.msra.mxu1 %v1108_v27 }
 0x2ca   :  { %1323 = vmatpush3.msra.mxu0 %v1127_v44  ;;  %1303 = vmatprep.subr.mxu1 %v1484_v0 }
 0x2cb   :  { %1324 = vmatprep.subr.mxu0 %v1484_v0  ;;  %1304 = vmatpush3.msra.mxu1 %v1107_v28 }
 0x2cc   :  { %1325 = vmatpush3.msra.mxu0 %v1126_v45  ;;  %1305 = vmatprep.subr.mxu1 %v1484_v0 }
 0x2cd   :  { %1326 = vmatprep.subr.mxu0 %v1484_v0  ;;  %1306 = vmatpush3.msra.mxu1 %v1106_v29 }
 0x2ce   :  { %1327 = vmatpush3.msra.mxu0 %v1125_v46  ;;  %1307 = vmatprep.subr.mxu1 %v1484_v0 }
 0x2cf   :  { %1328 = vmatprep.subr.mxu0 %v1484_v0  ;;  %1308 = vmatpush3.msra.mxu1 %v1105_v30 }
 0x2d0   :  { %1329 = vmatpush3.msra.mxu0 %v1124_v47  ;;  %1309 = vmatprep.subr.mxu1 %v1484_v0 }
 0x2d1   :  { %1330 = vmatprep.subr.mxu0 %v1484_v0  ;;  %1310 = vmatpush3.msra.mxu1 %v1104_v32 }
 0x2d2   :  { %1331 = vmatpush3.msra.mxu0 %v1123_v49  ;;  %1311 = vmatprep.subr.mxu1 %v1484_v0 }
 0x2d3   :  { %1333 = vmatmul.mubr.msk.f32.vlgmr.msra.gmra.mxu0 %vm57_vm2, %v496_v50  ;;  %1312 = vmatpush3.msra.mxu1 %v1103_v33 }
 0x2d4   :  { %1313 = vmatprep.mubr.msk.f32.mxu1 %vm1485_vm0, %v1484_v0  ;;  %1335 = vmatprep.subr.mxu1 %v1484_v0 }
 0x2d5   :  { %1354 = vmatprep.subr.mxu0 %v1484_v0  ;;  %1370 = vmatprep.mubr.msk.f32.mxu0 %vm1485_vm0, %v1484_v0 }
 0x2d6   :  { %1355 = vmatpush3.msra.mxu0 %v1130_v39 }
 0x2d7   :  { %1356 = vmatprep.subr.mxu0 %v1484_v0 }
 0x2d8   :  { %1357 = vmatpush3.msra.mxu0 %v1129_v42  ;;  %v1138_v42 = vld [vmem:[%s1857_s1 + $0xf0] sm:$0xff] }
 0x2d9   :  { %1358 = vmatprep.subr.mxu0 %v1484_v0 }
 0x2da   :  { %1359 = vmatpush3.msra.mxu0 %v1128_v43  ;;  %v1137_v43 = vld [vmem:[%s1857_s1 + $0xe8] sm:$0xff] }
 0x2db   :  { %1360 = vmatprep.subr.mxu0 %v1484_v0 }
 0x2dc   :  { %1361 = vmatpush3.msra.mxu0 %v1127_v44  ;;  %v1136_v44 = vld [vmem:[%s1857_s1 + $0xe0] sm:$0xff] }
 0x2dd   :  { %1362 = vmatprep.subr.mxu0 %v1484_v0 }
 0x2de   :  { %1363 = vmatpush3.msra.mxu0 %v1126_v45  ;;  %v1135_v45 = vld [vmem:[%s1857_s1 + $0xd8] sm:$0xff] }
 0x2df   :  { %1364 = vmatprep.subr.mxu0 %v1484_v0 }
 0x2e0   :  { %1365 = vmatpush3.msra.mxu0 %v1125_v46  ;;  %v1134_v46 = vld [vmem:[%s1857_s1 + $0xd0] sm:$0xff] }
 0x2e1   :  { %1366 = vmatprep.subr.mxu0 %v1484_v0 }
 0x2e2   :  { %1367 = vmatpush3.msra.mxu0 %v1124_v47  ;;  %v1133_v47 = vld [vmem:[%s1857_s1 + $0xc8] sm:$0xff] }
 0x2e3   :  { %1368 = vmatprep.subr.mxu0 %v1484_v0 }
 0x2e4   :  { %1369 = vmatpush3.msra.mxu0 %v1123_v49  ;;  %v1132_v49 = vld [vmem:[%s1857_s1 + $0xc0] sm:$0xff] }
 0x2e5   :  { %1392 = vmatprep.subr.mxu0 %v1484_v0 }
 0x383   :  { %v235_v52 = vpop.f32.mrf.mxu1  ;;  %v338_v53 = vpop.f32.mrf.mxu0 }
 0x384   :  { %v236_v54 = vadd.f32 %v1696_v51, %v235_v52  ;;  %v339_v55 = vadd.f32 %v1584_v11, %v338_v53 }
 0x385   :  { %v1277_v56 = vpop.f32.mrf.mxu1  ;;  %v1296_v57 = vpop.f32.mrf.mxu0 }
 0x386   :  { %1428 = vtanh.f32 %v236_v54  ;;  %v1117_v2 = vmul.f32 -1.442695, %v236_v54  ;;  %v1120_v3 = vmul.f32 -1.442695, %v339_v55  ;;  %v1784_v57 = vld [vmem:[%s1859_s2 + $0x3] ss:$0 sm:$0xff] }
 0x387   :  { %1430 = vtanh.f32 %v339_v55 }
 0x393   :  { %v1429_v59 = vpop.eup %1428  ;;  %v572_v60 = vpop.f32.mrf.mxu0 }
 0x394   :  { %v1431_v61 = vpop.eup %1430  ;;  %v573_v62 = vadd.f32 %v1703_v58, %v572_v60  ;;  %248 = vrot.lane.b32.xlu1 %v1429_v59, %s1486_s21 }
 0x395   :  { %351 = vrot.lane.b32.xlu0 %v1431_v61, %s1486_s21  ;;  %v1334_v63 = vpop.f32.mrf.mxu0 }
 0x396   :  { %1432 = vtanh.f32 %v573_v62  ;;  %v1144_v4 = vmul.f32 -1.442695, %v573_v62 }
 0x397   :  { %1434 = vpow2.f32 %v1117_v2 }
 0x398   :  { %1436 = vpow2.f32 %v1120_v3 }
 0x399   :  { %1438 = vpow2.f32 %v1144_v4 }
 0x3a3   :  { %v1433_v1 = vpop.eup %1432 }
 0x3a4   :  { %585 = vrot.lane.b32.xlu1 %v1433_v1, %s1486_s21  ;;  %v1435_v5 = vpop.eup %1434 }
 0x3a5   :  { %v1437_v6 = vpop.eup %1436  ;;  %v242_v7 = vadd.f32 1.0, %v1435_v5 }
 0x3a6   :  { %v345_v8 = vadd.f32 1.0, %v1437_v6  ;;  %v1439_v9 = vpop.eup %1438 }
 0x3a7   :  { %1440 = vrcp.f32 %v242_v7  ;;  %v579_v10 = vadd.f32 1.0, %v1439_v9 }
 0x3a8   :  { %1442 = vrcp.f32 %v345_v8 }
 0x3a9   :  { %1444 = vrcp.f32 %v579_v10 }
 0x3b4   :  { %v1441_v11 = vpop.eup %1440 }
 0x3b5   :  { %v1443_v13 = vpop.eup %1442  ;;  %v246_v20 = vmul.f32 0.0, %v1441_v11 }
 0x3b6   :  { %v1445_v17 = vpop.eup %1444  ;;  %v349_v22 = vmul.f32 %v1443_v13, %v1589_v24 }
 0x3b7   :  { %v583_v27 = vmul.f32 0.0, %v1445_v17 }
 0x406   :  { %v249_v12 = vpop.permute.xlu1 %248 }
 0x407   :  { %v251_v14 = vmul.f32 %v1441_v11, %v249_v12  ;;  %v352_v15 = vpop.permute.xlu0 %351 }
 0x408   :  { %v354_v16 = vmul.f32 %v1443_v13, %v352_v15 }
 0x409   :  { %253 = vrot.lane.b32.xlu0 %v251_v14, %s1487_s22 }
 0x40a   :  { %356 = vrot.lane.b32.xlu1 %v354_v16, %s1487_s22 }
 0x416   :  { %v586_v18 = vpop.permute.xlu1 %585 }
 0x417   :  { %v588_v19 = vmul.f32 %v1445_v17, %v586_v18 }
 0x419   :  { %590 = vrot.lane.b32.xlu0 %v588_v19, %s1487_s22 }
 0x47b   :  { %v254_v21 = vpop.permute.xlu0 %253 }
 0x47c   :  { %v1713_v23 = vadd.f32 %v254_v21, %v246_v20  ;;  %v357_v25 = vpop.permute.xlu1 %356 }
 0x47d   :  { %v359_v26 = vadd.f32 %v357_v25, %v349_v22 }
 0x47e   :  { %1446 = vtanh.f32 %v1713_v23 }
 0x47f   :  { %1448 = vtanh.f32 %v359_v26 }
 0x48b   :  { %v1447_v28 = vpop.eup %1446  ;;  %v591_v29 = vpop.permute.xlu0 %590 }
 0x48c   :  { %v1449_v30 = vpop.eup %1448  ;;  %v1716_v31 = vadd.f32 %v591_v29, %v583_v27  ;;  %259 = vrot.lane.b32.xlu1 %v1447_v28, %s1486_s21 }
 0x48d   :  { %362 = vrot.lane.b32.xlu0 %v1449_v30, %s1486_s21 }
 0x48e   :  { %1450 = vtanh.f32 %v1716_v31 }
 0x49b   :  { %v1451_v24 = vpop.eup %1450 }
 0x49c   :  { %596 = vrot.lane.b32.xlu1 %v1451_v24, %s1486_s21 }
 0x4fe   :  { %v260_v32 = vpop.permute.xlu1 %259 }
 0x4ff   :  { %v262_v33 = vmul.f32 %v1441_v11, %v260_v32  ;;  %v363_v34 = vpop.permute.xlu0 %362 }
 0x500   :  { %v365_v35 = vmul.f32 %v1443_v13, %v363_v34 }
 0x501   :  { %371 = vrot.lane.b32.xlu1 %v262_v33, %s1486_s21 }
 0x502   :  { %367 = vrot.lane.b32.xlu0 %v365_v35, %s1487_s22 }
 0x50e   :  { %v597_v36 = vpop.permute.xlu1 %596 }
 0x50f   :  { %v599_v37 = vmul.f32 %v1445_v17, %v597_v36 }
 0x511   :  { %710 = vrot.lane.b32.xlu1 %v599_v37, %s1486_s21  ;;  %601 = vrot.lane.b32.xlu0 %v599_v37, %s1487_s22 }
 0x573   :  { %v372_v38 = vpop.permute.xlu1 %371 }
 0x574   :  { %v368_v39 = vpop.permute.xlu0 %367 }
 0x575   :  { %v374_v41 = vsel %vm49_vm1, %v368_v39, %v372_v38 }
 0x576   :  { %1314 = vmatmul.mubr.msk.f32.vlgmr.msra.gmra.mxu1 %vm57_vm2, %v374_v41 }
 0x577   :  { %1336 = vmatpush3.msra.mxu1 %v1139_v40  ;;  %1351 = vmatprep.mubr.msk.f32.mxu1 %vm1485_vm0, %v1484_v0 }
 0x578   :  { %1337 = vmatprep.subr.mxu1 %v1484_v0 }
 0x579   :  { %1338 = vmatpush3.msra.mxu1 %v1138_v42 }
 0x57a   :  { %1339 = vmatprep.subr.mxu1 %v1484_v0 }
 0x57b   :  { %1340 = vmatpush3.msra.mxu1 %v1137_v43 }
 0x57c   :  { %1341 = vmatprep.subr.mxu1 %v1484_v0 }
 0x57d   :  { %1342 = vmatpush3.msra.mxu1 %v1136_v44 }
 0x57e   :  { %1343 = vmatprep.subr.mxu1 %v1484_v0 }
 0x57f   :  { %1344 = vmatpush3.msra.mxu1 %v1135_v45 }
 0x580   :  { %1345 = vmatprep.subr.mxu1 %v1484_v0 }
 0x581   :  { %1346 = vmatpush3.msra.mxu1 %v1134_v46 }
 0x582   :  { %1347 = vmatprep.subr.mxu1 %v1484_v0 }
 0x583   :  { %1348 = vmatpush3.msra.mxu1 %v1133_v47  ;;  %v602_v50 = vpop.permute.xlu0 %601  ;;  %v711_v52 = vpop.permute.xlu1 %710 }
 0x584   :  { %v604_v53 = vsel %vm49_vm1, %v602_v50, 0.0  ;;  %1349 = vmatprep.subr.mxu1 %v1484_v0  ;;  %v713_v54 = vsel %vm49_vm1, %v1148_v48, %v711_v52 }
 0x585   :  { %1350 = vmatpush3.msra.mxu1 %v1132_v49  ;;  %1371 = vmatmul.mubr.msk.f32.vlgmr.msra.gmra.mxu0 %vm57_vm2, %v713_v54 }
 0x586   :  { %1352 = vmatmul.mubr.msk.f32.vlgmr.msra.gmra.mxu1 %vm57_vm2, %v604_v53  ;;  %1373 = vmatprep.subr.mxu1 %v1484_v0 }
 0x587   :  { %1374 = vmatpush3.msra.mxu1 %v1139_v40  ;;  %1389 = vmatprep.mubr.msk.f32.mxu1 %vm1485_vm0, %v1484_v0 }
 0x588   :  { %1375 = vmatprep.subr.mxu1 %v1484_v0  ;;  %1408 = vmatprep.mubr.msk.f32.mxu0 %vm1485_vm0, %v1484_v0 }
 0x589   :  { %1376 = vmatpush3.msra.mxu1 %v1138_v42 }
 0x58a   :  { %1377 = vmatprep.subr.mxu1 %v1484_v0 }
 0x58b   :  { %1378 = vmatpush3.msra.mxu1 %v1137_v43 }
 0x58c   :  { %1379 = vmatprep.subr.mxu1 %v1484_v0 }
 0x58d   :  { %1380 = vmatpush3.msra.mxu1 %v1136_v44 }
 0x58e   :  { %1381 = vmatprep.subr.mxu1 %v1484_v0 }
 0x58f   :  { %1382 = vmatpush3.msra.mxu1 %v1135_v45 }
 0x590   :  { %1383 = vmatprep.subr.mxu1 %v1484_v0 }
 0x591   :  { %1384 = vmatpush3.msra.mxu1 %v1134_v46 }
 0x592   :  { %1385 = vmatprep.subr.mxu1 %v1484_v0 }
 0x593   :  { %1386 = vmatpush3.msra.mxu1 %v1133_v47 }
 0x594   :  { %1387 = vmatprep.subr.mxu1 %v1484_v0 }
 0x595   :  { %1388 = vmatpush3.msra.mxu1 %v1132_v49 }
 0x596   :  { %1411 = vmatprep.subr.mxu1 %v1484_v0 }
 0x636   :  { %v444_v55 = vpop.f32.mrf.mxu1 }
 0x637   :  { %v445_v25 = vadd.f32 %v1696_v51, %v444_v55 }
 0x638   :  { %v1315_v56 = vpop.f32.mrf.mxu1 }
 0x645   :  { %v783_v59 = vpop.f32.mrf.mxu0 }
 0x646   :  { %v680_v60 = vpop.f32.mrf.mxu1  ;;  %v784_v61 = vadd.f32 %v1703_v58, %v783_v59  ;;  %v932_v59 = vld [vmem:[%s1860_s3 + $0x30] sm:$0xff] }
 0x647   :  { %v681_v62 = vadd.f32 %v1784_v57, %v680_v60  ;;  %v1372_v63 = vpop.f32.mrf.mxu0  ;;  %v931_v60 = vld [vmem:[%s1860_s3 + $0x28] sm:$0xff] }
 0x648   :  { %1452 = vtanh.f32 %v784_v61  ;;  %v1353_v1 = vpop.f32.mrf.mxu1  ;;  %v1150_v4 = vmul.f32 -1.442695, %v784_v61  ;;  %v930_v61 = vld [vmem:[%s1860_s3 + $0x20] sm:$0xff]  ;;  %v928_v63 = vld [vmem:[%s1860_s3 + $0x10] sm:$0xff] }
 0x649   :  { %1454 = vtanh.f32 %v681_v62  ;;  %v1147_v5 = vmul.f32 -1.442695, %v681_v62  ;;  %v929_v62 = vld [vmem:[%s1860_s3 + $0x18] sm:$0xff] }
 0x64a   :  { %1456 = vpow2.f32 %v1150_v4 }
 0x64b   :  { %1458 = vpow2.f32 %v1147_v5 }
 0x655   :  { %v1453_v2 = vpop.eup %1452 }
 0x656   :  { %v1455_v3 = vpop.eup %1454  ;;  %796 = vrot.lane.b32.xlu1 %v1453_v2, %s1486_s21  ;;  %v927_v2 = vld [vmem:[%s1860_s3 + $0x8] sm:$0xff] }
 0x657   :  { %693 = vrot.lane.b32.xlu0 %v1455_v3, %s1486_s21  ;;  %v1457_v6 = vpop.eup %1456  ;;  %v926_v3 = vld [vmem:[%s1860_s3] sm:$0xff] }
 0x658   :  { %v1459_v7 = vpop.eup %1458  ;;  %v790_v8 = vadd.f32 1.0, %v1457_v6 }
 0x659   :  { %v687_v58 = vadd.f32 1.0, %v1459_v7 }
 0x65a   :  { %1460 = vrcp.f32 %v790_v8 }
 0x65b   :  { %1462 = vrcp.f32 %v687_v58  ;;  %v1015_v58 = vld [vmem:[%s1861_s5] sm:$0xff] }
 0x667   :  { %v1461_v9 = vpop.eup %1460 }
 0x668   :  { %v1463_v11 = vpop.eup %1462  ;;  %v794_v15 = vmul.f32 %v1461_v9, %v1716_v31  ;;  %v1122_v31 = vmul.f32 -1.442695, %v445_v25 }
 0x669   :  { %v691_v16 = vmul.f32 0.0, %v1463_v11 }
 0x6c8   :  { %v797_v10 = vpop.permute.xlu1 %796 }
 0x6c9   :  { %v694_v12 = vpop.permute.xlu0 %693  ;;  %v799_v13 = vmul.f32 %v1461_v9, %v797_v10 }
 0x6ca   :  { %v696_v14 = vmul.f32 %v1463_v11, %v694_v12 }
 0x6cb   :  { %801 = vrot.lane.b32.xlu1 %v799_v13, %s1487_s22 }
 0x6cc   :  { %698 = vrot.lane.b32.xlu0 %v696_v14, %s1487_s22 }
 0x73d   :  { %v802_v17 = vpop.permute.xlu1 %801 }
 0x73e   :  { %v699_v18 = vpop.permute.xlu0 %698  ;;  %v804_v19 = vadd.f32 %v802_v17, %v794_v15 }
 0x73f   :  { %v701_v20 = vadd.f32 %v699_v18, %v691_v16 }
 0x740   :  { %1464 = vtanh.f32 %v804_v19 }
 0x741   :  { %1466 = vtanh.f32 %v701_v20 }
 0x742   :  { %1468 = vtanh.f32 %v445_v25 }
 0x743   :  { %1470 = vpow2.f32 %v1122_v31 }
 0x74d   :  { %v1465_v21 = vpop.eup %1464 }
 0x74e   :  { %v1467_v22 = vpop.eup %1466  ;;  %807 = vrot.lane.b32.xlu1 %v1465_v21, %s1486_s21 }
 0x74f   :  { %704 = vrot.lane.b32.xlu0 %v1467_v22, %s1486_s21  ;;  %v1469_v30 = vpop.eup %1468 }
 0x750   :  { %v1471_v24 = vpop.eup %1470 }
 0x751   :  { %v451_v32 = vadd.f32 1.0, %v1471_v24 }
 0x753   :  { %1472 = vrcp.f32 %v451_v32 }
 0x760   :  { %v1473_v35 = vpop.eup %1472 }
 0x761   :  { %v455_v38 = vmul.f32 %v1473_v35, %v1713_v23 }
 0x7c0   :  { %v808_v26 = vpop.permute.xlu1 %807 }
 0x7c1   :  { %v705_v27 = vpop.permute.xlu0 %704  ;;  %v810_v28 = vmul.f32 %v1461_v9, %v808_v26  ;;  %v1153_v9 = vld [vmem:[%s1863_s4] ss:$0 sm:$0xff] }
 0x7c2   :  { %v707_v29 = vmul.f32 %v1463_v11, %v705_v27 }
 0x7c3   :  { %812 = vrot.lane.b32.xlu0 %v810_v28, %s1487_s22 }
 0x7c4   :  { %816 = vrot.lane.b32.xlu1 %v707_v29, %s1486_s21 }
 0x7c7   :  { %457 = vrot.lane.b32.xlu0 %v1469_v30, %s1486_s21 }
 0x835   :  { %v813_v33 = vpop.permute.xlu0 %812 }
 0x836   :  { %v817_v34 = vpop.permute.xlu1 %816 }
 0x837   :  { %v819_v51 = vsel %vm49_vm1, %v813_v33, %v817_v34 }
 0x838   :  { %1390 = vmatmul.mubr.msk.f32.vlgmr.msra.gmra.mxu1 %vm57_vm2, %v819_v51 }
 0x839   :  { %v458_v36 = vpop.permute.xlu0 %457  ;;  %1413 = vmatprep.mubr.msk.f32.mxu1 %vm1485_vm0, %v1484_v0  ;;  %1412 = vmatpush3.msra.mxu1 %v1015_v58 }
 0x83a   :  { %v460_v37 = vmul.f32 %v1473_v35, %v458_v36 }
 0x83c   :  { %462 = vrot.lane.b32.xlu0 %v460_v37, %s1487_s22 }
 0x8ae   :  { %v463_v39 = vpop.permute.xlu0 %462 }
 0x8af   :  { %v465_v40 = vadd.f32 %v463_v39, %v455_v38 }
 0x8b1   :  { %1474 = vtanh.f32 %v465_v40 }
 0x8be   :  { %v1475_v41 = vpop.eup %1474 }
 0x8bf   :  { %468 = vrot.lane.b32.xlu0 %v1475_v41, %s1486_s21 }
 0x8f8   :  { %v889_v42 = vpop.f32.mrf.mxu1 }
 0x8f9   :  { %v890_v43 = vadd.f32 %v1784_v57, %v889_v42  ;;  %v933_v57 = vld [vmem:[%s1860_s3 + $0x38] sm:$0xff] }
 0x8fa   :  { %v1391_v44 = vpop.f32.mrf.mxu1  ;;  %1393 = vmatpush3.msra.mxu0 %v933_v57 }
 0x8fb   :  { %1476 = vtanh.f32 %v890_v43  ;;  %v1152_v48 = vmul.f32 -1.442695, %v890_v43  ;;  %1394 = vmatprep.subr.mxu0 %v1484_v0 }
 0x8fc   :  { %1395 = vmatpush3.msra.mxu0 %v932_v59 }
 0x8fd   :  { %1478 = vpow2.f32 %v1152_v48  ;;  %1396 = vmatprep.subr.mxu0 %v1484_v0 }
 0x8fe   :  { %1397 = vmatpush3.msra.mxu0 %v931_v60 }
 0x8ff   :  { %1398 = vmatprep.subr.mxu0 %v1484_v0 }
 0x900   :  { %1399 = vmatpush3.msra.mxu0 %v930_v61 }
 0x901   :  { %1400 = vmatprep.subr.mxu0 %v1484_v0 }
 0x902   :  { %1401 = vmatpush3.msra.mxu0 %v929_v62 }
 0x903   :  { %1402 = vmatprep.subr.mxu0 %v1484_v0 }
 0x904   :  { %1403 = vmatpush3.msra.mxu0 %v928_v63 }
 0x905   :  { %1404 = vmatprep.subr.mxu0 %v1484_v0 }
 0x906   :  { %1405 = vmatpush3.msra.mxu0 %v927_v2 }
 0x907   :  { %1406 = vmatprep.subr.mxu0 %v1484_v0  ;;  %v12_v0 = vstv %s1862_s6 }
 0x908   :  { %v1477_v45 = vpop.eup %1476  ;;  %1407 = vmatpush3.msra.mxu0 %v926_v3  ;;  %13 = vst [vmem:[#allocation2] sm:$0x1] %v12_v0 }
 0x909   :  { %902 = vrot.lane.b32.xlu1 %v1477_v45, %s1486_s21 }
 0x90a   :  { %v1479_v23 = vpop.eup %1478 }
 0x90b   :  { %v896_v49 = vadd.f32 1.0, %v1479_v23 }
 0x90d   :  { %1480 = vrcp.f32 %v896_v49 }
 0x90f   :  { %v1155_v14 = vld [vmem:[#allocation2] ss:$0 sm:$0xff] }
 0x91a   :  { %v1481_v50 = vpop.eup %1480 }
 0x91b   :  { %v900_v54 = vmul.f32 %v1481_v50, %v701_v20 }
 0x931   :  { %v469_v46 = vpop.permute.xlu0 %468 }
 0x932   :  { %v471_v47 = vmul.f32 %v1473_v35, %v469_v46 }
 0x934   :  { %918 = vrot.lane.b32.xlu0 %v471_v47, %s1487_s22 }
 0x97b   :  { %v903_v52 = vpop.permute.xlu1 %902 }
 0x97c   :  { %v905_v53 = vmul.f32 %v1481_v50, %v903_v52 }
 0x97e   :  { %907 = vrot.lane.b32.xlu1 %v905_v53, %s1487_s22 }
 0x9a6   :  { %v919_v6 = vpop.permute.xlu0 %918 }
 0x9f0   :  { %v908_v55 = vpop.permute.xlu1 %907 }
 0x9f1   :  { %v910_v56 = vadd.f32 %v908_v55, %v900_v54 }
 0x9f3   :  { %1482 = vtanh.f32 %v910_v56 }
 0xa00   :  { %v1483_v1 = vpop.eup %1482 }
 0xa01   :  { %913 = vrot.lane.b32.xlu1 %v1483_v1, %s1486_s21 }
 0xa73   :  { %v914_v4 = vpop.permute.xlu1 %913 }
 0xa74   :  { %v916_v5 = vmul.f32 %v1481_v50, %v914_v4 }
 0xa76   :  { %922 = vrot.lane.b32.xlu1 %v916_v5, %s1486_s21 }
 0xae8   :  { %v923_v7 = vpop.permute.xlu1 %922 }
 0xae9   :  { %v925_v8 = vsel %vm49_vm1, %v919_v6, %v923_v7 }
 0xaea   :  { %1409 = vmatmul.mubr.msk.f32.vlgmr.msra.gmra.mxu0 %vm57_vm2, %v925_v8 }
 0xbaa   :  { %v1010_v10 = vpop.f32.mrf.mxu0 }
 0xbab   :  { %v1011_v11 = vadd.f32 %v1153_v9, %v1010_v10 }
 0xbac   :  { %v1410_v12 = vpop.f32.mrf.mxu0 }
 0xbad   :  { %v1014_v13 = vmax.f32 %v1011_v11, 0.0 }
 0xbaf   :  { %1414 = vmatmul.mubr.msk.f32.vlgmr.msra.gmra.mxu1 %vm1023_vm3, %v1014_v13 }
 0xc6f   :  { %v1093_v15 = vpop.f32.mrf.mxu1 }
 0xc70   :  { %v1094_v16 = vadd.f32 %v1155_v14, %v1093_v15 }
 0xc71   :  { %v1415_v17 = vpop.f32.mrf.mxu1 }
 0xc72   :  { %1098 = vst.msk [vmem:[%s1864_s7] sm:$0xff] %vm1097_vm4, %v1094_v16 }

</bundles_post_ra>
